<compile_context>
chip_gen: v7x
topology: tpu7x:2x2x1
jax: 0.10.0
libtpu: 0.0.40
codegen_flags: <defaults>
</compile_context>

<pallas_src>
import functools
import math

import jax
import jax.numpy as jnp
from jax.experimental import pallas as pl
from jax.experimental.pallas import tpu as pltpu

LN_EPS = 1e-5                      # nn.LayerNorm default
_INV_SQRT2 = 1.0 / math.sqrt(2.0)  # exact GELU


def _layernorm(x, gamma, beta):
    mu = jnp.mean(x, axis=-1, keepdims=True)
    var = jnp.mean((x - mu) ** 2, axis=-1, keepdims=True)
    return (x - mu) * jax.lax.rsqrt(var + LN_EPS) * gamma + beta


# ---------------------------------------------------------------------------
# Fused kernel: grid = (b_tiles, depth).  Activation carried in VMEM scratch
# per batch tile; head (LayerNorm + Linear(dim,128)) applied on last depth
# step.
# ---------------------------------------------------------------------------
def _vit_kernel(x_hbm_ref, ahat_ref,
                ln1g_ref, ln1b_ref, wqkv_ref, wout_ref, bout_ref,
                ln2g_ref, ln2b_ref, w1_ref, b1_ref, w2_ref, b2_ref,
                hg_ref, hb_ref, hw_ref, hbias_ref,
                o_ref, xc_ref, oh_ref, dma_sem,
                *, B_tile, N, heads, dim_head):
    b = pl.program_id(0)
    d = pl.program_id(1)
    M = B_tile * N
    inner = heads * dim_head

    # Load this batch tile's activation slab from HBM once (first layer only).
    # x lives in HBM (pl.ANY) so it does not occupy a double-buffered pipeline
    # slot for the whole kernel.
    @pl.when(d == 0)
    def _():
        start = b * M
        if M % 8 == 0:
            start = pl.multiple_of(start, 8)
        cp = pltpu.make_async_copy(x_hbm_ref.at[pl.ds(start, M)], xc_ref,
                                   dma_sem)
        cp.start()
        cp.wait()

    x = xc_ref[...]                                      # (M, D) f32

    # ------------------- PreNorm + Attention + residual -------------------
    xn = _layernorm(x, ln1g_ref[0], ln1b_ref[0])
    qkv = jnp.dot(xn.astype(jnp.bfloat16), wqkv_ref[0],   # bf16 MXU, f32 acc
                  preferred_element_type=jnp.float32)     # (M, 3*inner)

    # softmax scale already folded into the q columns of wqkv at init time
    q_all = qkv[:, 0:inner]
    k_all = qkv[:, inner:2 * inner]
    v_all = qkv[:, 2 * inner:3 * inner]
    a_hat = jnp.broadcast_to(ahat_ref[...][None, :, :], (B_tile, N, N))

    # Per-head attention; each head's context is written into a column slab of
    # the (M, inner) VMEM scratch so the output projection is ONE full-depth
    # matmul after the loop.
    # TODO(synk): at production head counts (8-16) replace the static unroll
    # with lax.fori_loop (or a batched 'bhnd,bhmd->bhnm' einsum with a
    # head-major qkv layout) to bound vreg live ranges / lane relayouts.
    for h in range(heads):
        sl = slice(h * dim_head, (h + 1) * dim_head)
        qh = q_all[:, sl].reshape(B_tile, N, dim_head).astype(jnp.bfloat16)
        kh = k_all[:, sl].reshape(B_tile, N, dim_head).astype(jnp.bfloat16)
        vh = v_all[:, sl].reshape(B_tile, N, dim_head).astype(jnp.bfloat16)

        dots = jnp.einsum('bnd,bmd->bnm', qh, kh,
                          preferred_element_type=jnp.float32)       # (Bt,N,N)
        dots = dots - jnp.max(dots, axis=-1, keepdims=True)
        e = jnp.exp(dots)
        p = e * pl.reciprocal(jnp.sum(e, axis=-1, keepdims=True), approx=True)
        p = p + a_hat                          # graph bias AFTER softmax (ref)

        oh = jnp.einsum('bnm,bmd->bnd', p.astype(jnp.bfloat16), vh,
                        preferred_element_type=jnp.float32)         # (Bt,N,dh)
        oh_ref[:, sl] = oh.reshape(M, dim_head)

    # Single (M, inner) x (inner, D) output projection (full MXU contraction
    # depth instead of `heads` separate K=dim_head matmuls).
    attn_out = jnp.dot(oh_ref[...].astype(jnp.bfloat16), wout_ref[0],
                       preferred_element_type=jnp.float32)
    x = x + attn_out + bout_ref[0]                        # residual

    # ------------------- PreNorm + FeedForward + residual ------------------
    xn = _layernorm(x, ln2g_ref[0], ln2b_ref[0])
    hdn = jnp.dot(xn.astype(jnp.bfloat16), w1_ref[0],
                  preferred_element_type=jnp.float32) + b1_ref[0]
    # exact (erf) GELU to match torch.nn.GELU(approximate='none').  If parity
    # tolerance allows, the tanh approximation trims the largest pure-VPU
    # expression in the kernel.
    hdn = 0.5 * hdn * (1.0 + jax.lax.erf(hdn * _INV_SQRT2))
    ff = jnp.dot(hdn.astype(jnp.bfloat16), w2_ref[0],
                 preferred_element_type=jnp.float32) + b2_ref[0]
    x = x + ff

    xc_ref[...] = x                                       # carry to next layer

    # ----------------- mlp_head on the last layer step ---------------------
    @pl.when(d == pl.num_programs(1) - 1)
    def _():
        hn = _layernorm(x, hg_ref[...], hb_ref[...])
        o_ref[...] = (jnp.dot(hn.astype(jnp.bfloat16), hw_ref[...],
                              preferred_element_type=jnp.float32)
                      + hbias_ref[...])                   # (M, 128) lane-dense


# ---------------------------------------------------------------------------
# Wrapper
# ---------------------------------------------------------------------------
def _vmem_limit_bytes():
    # Budget per generation: ~3/4 of physical VMEM, capped at 100 MiB.
    # v7x (64 MiB)  -> ~48 MiB;  v5e / v6e (128 MiB) -> ~96 MiB.
    try:
        cap = pltpu.get_tpu_info().vmem_capacity_bytes
    except Exception:
        cap = 64 * 1024 * 1024
    return min(int(cap * 3 // 4), 100 * 1024 * 1024)


def vit_forward(x, params, a_hat, *, heads, dim_head, b_tiles=1):
    B, N, D = x.shape
    assert B % b_tiles == 0, "b_tiles must divide the batch"
    B_tile = B // b_tiles
    depth = params["wqkv"].shape[0]
    inner = heads * dim_head
    mlp_dim = params["w1"].shape[2]
    out_dim = params["head_w"].shape[1]
    M = B * N
    Mt = B_tile * N

    kernel = functools.partial(_vit_kernel, B_tile=B_tile, N=N, heads=heads,
                               dim_head=dim_head)

    def const_full(shape):                    # constant-index small input
        return pl.BlockSpec(shape, lambda b, d: (0,) * len(shape))

    def layer_vec(n):                         # (depth, 1, n) -> (1, 1, n)
        return pl.BlockSpec((1, 1, n), lambda b, d: (d, 0, 0))

    def layer_mat(r, c):                      # (depth, r, c) -> (1, r, c)
        return pl.BlockSpec((1, r, c), lambda b, d: (d, 0, 0))

    grid_spec = pltpu.PrefetchScalarGridSpec(
        num_scalar_prefetch=0,
        grid=(b_tiles, depth),
        in_specs=[
            pl.BlockSpec(memory_space=pl.ANY),  # x stays in HBM; DMA'd at d==0
            const_full((N, N)),                 # a_hat
            layer_vec(D), layer_vec(D),         # attn LN gamma / beta
            layer_mat(D, 3 * inner),            # wqkv (bf16, scale folded in)
            layer_mat(inner, D),                # wout (bf16)
            layer_vec(D),                       # bout
            layer_vec(D), layer_vec(D),         # ff LN gamma / beta
            layer_mat(D, mlp_dim),              # w1 (bf16)
            layer_vec(mlp_dim),                 # b1
            layer_mat(mlp_dim, D),              # w2 (bf16)
            layer_vec(D),                       # b2
            const_full((1, D)), const_full((1, D)),   # head LN gamma / beta
            const_full((D, out_dim)),                 # head W (bf16)
            const_full((1, out_dim)),                 # head bias
        ],
        out_specs=pl.BlockSpec((Mt, out_dim), lambda b, d: (b, 0)),
        scratch_shapes=[
            pltpu.VMEM((Mt, D), jnp.float32),       # carried activation
            pltpu.VMEM((Mt, inner), jnp.float32),   # per-head context slab
            pltpu.SemaphoreType.DMA(()),            # x load semaphore
        ],
    )

    out = pl.pallas_call(
        kernel,
        out_shape=jax.ShapeDtypeStruct((M, out_dim), jnp.float32),
        grid_spec=grid_spec,
        compiler_params=pltpu.CompilerParams(
            # batch tiles are independent (megacore-parallel on v7x);
            # depth carries state -> sequential.
            dimension_semantics=("parallel", "arbitrary"),
            vmem_limit_bytes=_vmem_limit_bytes(),
        ),
    )(x.reshape(M, D), a_hat,
      params["ln1_g"], params["ln1_b"], params["wqkv"], params["wout"],
      params["bout"], params["ln2_g"], params["ln2_b"], params["w1"],
      params["b1"], params["w2"], params["b2"],
      params["head_ln_g"], params["head_ln_b"], params["head_w"],
      params["head_b"])
    return out.reshape(B, N, out_dim)


# ---------------------------------------------------------------------------
# Deterministic parameter construction (synthetic, not a checkpoint).
# Matmul weights stored (in, out) and in bf16; LayerNorm params / biases f32.
# The softmax scale (dim_head**-0.5) is folded into wqkv's q columns.
# ---------------------------------------------------------------------------
def init_params(key, *, dim, depth, heads, dim_head, mlp_dim, out_dim=128):
    inner = heads * dim_head
    scale = dim_head ** (-0.5)

    def uni(k, shape, fan_in):
        bound = 1.0 / math.sqrt(fan_in)
        return jax.random.uniform(k, shape, jnp.float32, -bound, bound)

    ln1_g, ln1_b, wqkv, wout, bout = [], [], [], [], []
    ln2_g, ln2_b, w1, b1, w2, b2 = [], [], [], [], [], []
    for _ in range(depth):
        key, k1, k2, k3, k4, k5, k6, k7 = jax.random.split(key, 8)
        ln1_g.append(jnp.ones((1, dim), jnp.float32))
        ln1_b.append(jnp.zeros((1, dim), jnp.float32))
        wqkv.append(uni(k1, (dim, 3 * inner), dim))       # to_qkv, bias=False
        wout.append(uni(k2, (inner, dim), inner))
        bout.append(uni(k3, (1, dim), inner))
        ln2_g.append(jnp.ones((1, dim), jnp.float32))
        ln2_b.append(jnp.zeros((1, dim), jnp.float32))
        w1.append(uni(k4, (dim, mlp_dim), dim))
        b1.append(uni(k5, (1, mlp_dim), dim))
        w2.append(uni(k6, (mlp_dim, dim), mlp_dim))
        b2.append(uni(k7, (1, dim), mlp_dim))

    wqkv = jnp.stack(wqkv)
    wqkv = wqkv.at[:, :, :inner].multiply(scale)          # fold softmax scale

    key, kh, kb = jax.random.split(key, 3)
    return dict(
        ln1_g=jnp.stack(ln1_g), ln1_b=jnp.stack(ln1_b),
        wqkv=wqkv.astype(jnp.bfloat16),
        wout=jnp.stack(wout).astype(jnp.bfloat16),
        bout=jnp.stack(bout),
        ln2_g=jnp.stack(ln2_g), ln2_b=jnp.stack(ln2_b),
        w1=jnp.stack(w1).astype(jnp.bfloat16), b1=jnp.stack(b1),
        w2=jnp.stack(w2).astype(jnp.bfloat16), b2=jnp.stack(b2),
        head_ln_g=jnp.ones((1, dim), jnp.float32),
        head_ln_b=jnp.zeros((1, dim), jnp.float32),
        head_w=uni(kh, (dim, out_dim), dim).astype(jnp.bfloat16),
        head_b=uni(kb, (1, out_dim), dim),
    )


def compute_a_hat(adj):
    # glue (plain JAX): mask = ceil(adj); A = mask + I; A_hat = D^-1/2 A D^-1/2
    V = adj.shape[0]
    mask = jnp.ceil(adj)
    A = mask + jnp.eye(V, dtype=adj.dtype)
    D = A.sum(axis=1)
    D_hat = jnp.diag(D ** -0.5)
    return D_hat @ A @ D_hat


if __name__ == "__main__":
    # small, forward-consistent shapes: V graph nodes = seq length
    B, V, dim = 2, 8, 32
    depth, heads, dim_head, mlp_dim = 2, 2, 8, 64

    key = jax.random.PRNGKey(0)
    k_adj, k_x, k_p = jax.random.split(key, 3)

    # adjacency with values in [0, 1); zero out roughly half the entries
    u = jax.random.uniform(k_adj, (V, V), jnp.float32)
    adj = jnp.where(u > 0.5, u, 0.0)
    a_hat = compute_a_hat(adj)

    x = jax.random.normal(k_x, (B, V, dim), jnp.float32)
    params = init_params(k_p, dim=dim, depth=depth, heads=heads,
                         dim_head=dim_head, mlp_dim=mlp_dim, out_dim=128)

    fwd = jax.jit(functools.partial(vit_forward, heads=heads,
                                    dim_head=dim_head, b_tiles=2))
    out = fwd(x, params, a_hat)
    out = jax.block_until_ready(out)
    assert out.shape == (B, V, 128), out.shape
    assert jnp.all(jnp.isfinite(out))
    print("KERNEL_OK")
</pallas_src>

<mosaic_0001>
module attributes {stable_mosaic.version = 11 : i64} {
  func.func @_vit_kernel(%arg0: i32, %arg1: i32, %arg2: memref<16x32xf32, #tpu.memory_space<any>>, %arg3: memref<8x8xf32, #tpu.memory_space<vmem>>, %arg4: memref<1x1x32xf32, #tpu.memory_space<vmem>>, %arg5: memref<1x1x32xf32, #tpu.memory_space<vmem>>, %arg6: memref<1x32x48xbf16, #tpu.memory_space<vmem>>, %arg7: memref<1x16x32xbf16, #tpu.memory_space<vmem>>, %arg8: memref<1x1x32xf32, #tpu.memory_space<vmem>>, %arg9: memref<1x1x32xf32, #tpu.memory_space<vmem>>, %arg10: memref<1x1x32xf32, #tpu.memory_space<vmem>>, %arg11: memref<1x32x64xbf16, #tpu.memory_space<vmem>>, %arg12: memref<1x1x64xf32, #tpu.memory_space<vmem>>, %arg13: memref<1x64x32xbf16, #tpu.memory_space<vmem>>, %arg14: memref<1x1x32xf32, #tpu.memory_space<vmem>>, %arg15: memref<1x32xf32, #tpu.memory_space<vmem>>, %arg16: memref<1x32xf32, #tpu.memory_space<vmem>>, %arg17: memref<32x128xbf16, #tpu.memory_space<vmem>>, %arg18: memref<1x128xf32, #tpu.memory_space<vmem>>, %arg19: memref<8x128xf32, #tpu.memory_space<vmem>>, %arg20: memref<8x32xf32, #tpu.memory_space<vmem>>, %arg21: memref<8x16xf32, #tpu.memory_space<vmem>>, %arg22: memref<!tpu.dma_semaphore, #tpu.memory_space<semaphore_mem>>) attributes {dimension_semantics = [#tpu.dimension_semantics<parallel>, #tpu.dimension_semantics<arbitrary>], iteration_bounds = array<i64: 2, 2>, scalar_prefetch = 0 : i64, scratch_operands = 3 : i64, tpu.core_type = #tpu.core_type<tc>, window_params = [{}, {pipeline_mode = #tpu.pipeline_mode<synchronous>, transform_indices = @transform_1, window_bounds = array<i64: 8, 8>}, {transform_indices = @transform_2, window_bounds = array<i64: 1, 1, 32>}, {transform_indices = @transform_3, window_bounds = array<i64: 1, 1, 32>}, {transform_indices = @transform_4, window_bounds = array<i64: 1, 32, 48>}, {transform_indices = @transform_5, window_bounds = array<i64: 1, 16, 32>}, {transform_indices = @transform_6, window_bounds = array<i64: 1, 1, 32>}, {transform_indices = @transform_7, window_bounds = array<i64: 1, 1, 32>}, {transform_indices = @transform_8, window_bounds = array<i64: 1, 1, 32>}, {transform_indices = @transform_9, window_bounds = array<i64: 1, 32, 64>}, {transform_indices = @transform_10, window_bounds = array<i64: 1, 1, 64>}, {transform_indices = @transform_11, window_bounds = array<i64: 1, 64, 32>}, {transform_indices = @transform_12, window_bounds = array<i64: 1, 1, 32>}, {pipeline_mode = #tpu.pipeline_mode<synchronous>, transform_indices = @transform_13, window_bounds = array<i64: 1, 32>}, {pipeline_mode = #tpu.pipeline_mode<synchronous>, transform_indices = @transform_14, window_bounds = array<i64: 1, 32>}, {pipeline_mode = #tpu.pipeline_mode<synchronous>, transform_indices = @transform_15, window_bounds = array<i64: 32, 128>}, {pipeline_mode = #tpu.pipeline_mode<synchronous>, transform_indices = @transform_16, window_bounds = array<i64: 1, 128>}, {transform_indices = @transform_17, window_bounds = array<i64: 8, 128>}]} {
    %c0_i32 = arith.constant 0 : i32
    %0 = arith.cmpi eq, %arg1, %c0_i32 : i32
    %1 = arith.extui %0 : i1 to i32
    %c0_i32_0 = arith.constant 0 : i32
    %2 = arith.cmpi ne, %1, %c0_i32_0 : i32
    scf.if %2 {
      %c8_i32 = arith.constant 8 : i32
      %154 = arith.muli %arg0, %c8_i32 : i32
      %155 = tpu.assume_multiple %154, 8 : i32
      %c0_i32_69 = arith.constant 0 : i32
      %156 = tpu.memref_slice %arg2[%155, %c0_i32_69] : memref<16x32xf32, #tpu.memory_space<any>> -> memref<8x32xf32, #tpu.memory_space<any>>
      tpu.enqueue_dma source(%156 : memref<8x32xf32, #tpu.memory_space<any>>) target(%arg20 : memref<8x32xf32, #tpu.memory_space<vmem>>) target_semaphore(%arg22 : memref<!tpu.dma_semaphore, #tpu.memory_space<semaphore_mem>>)
      %c0_i32_70 = arith.constant 0 : i32
      %157 = tpu.memref_slice %arg2[%155, %c0_i32_70] : memref<16x32xf32, #tpu.memory_space<any>> -> memref<8x32xf32, #tpu.memory_space<any>>
      tpu.wait_dma2 semaphore(%arg22 : memref<!tpu.dma_semaphore, #tpu.memory_space<semaphore_mem>>) src(%157 : memref<8x32xf32, #tpu.memory_space<any>>) dst(%arg20 : memref<8x32xf32, #tpu.memory_space<vmem>>)
    } else {
    }
    %c0 = arith.constant 0 : index
    %c0_1 = arith.constant 0 : index
    %3 = vector.load %arg20[%c0, %c0_1] : memref<8x32xf32, #tpu.memory_space<vmem>>, vector<8x32xf32>
    %c0_2 = arith.constant 0 : index
    %c0_3 = arith.constant 0 : index
    %c0_4 = arith.constant 0 : index
    %4 = vector.load %arg4[%c0_2, %c0_3, %c0_4] : memref<1x1x32xf32, #tpu.memory_space<vmem>>, vector<1x1x32xf32>
    %5 = vector.shape_cast %4 : vector<1x1x32xf32> to vector<1x32xf32>
    %c0_5 = arith.constant 0 : index
    %c0_6 = arith.constant 0 : index
    %c0_7 = arith.constant 0 : index
    %6 = vector.load %arg5[%c0_5, %c0_6, %c0_7] : memref<1x1x32xf32, #tpu.memory_space<vmem>>, vector<1x1x32xf32>
    %7 = vector.shape_cast %6 : vector<1x1x32xf32> to vector<1x32xf32>
    %cst = arith.constant dense<0.000000e+00> : vector<8xf32>
    %8 = vector.multi_reduction <add>, %3, %cst [1] : vector<8x32xf32> to vector<8xf32>
    %9 = vector.shape_cast %8 : vector<8xf32> to vector<8x1xf32>
    %cst_8 = arith.constant 3.200000e+01 : f32
    %10 = vector.broadcast %cst_8 : f32 to vector<8x1xf32>
    %11 = arith.divf %9, %10 : vector<8x1xf32>
    %12 = vector.broadcast %11 : vector<8x1xf32> to vector<8x32xf32>
    %13 = arith.subf %3, %12 : vector<8x32xf32>
    %14 = arith.mulf %13, %13 : vector<8x32xf32>
    %cst_9 = arith.constant dense<0.000000e+00> : vector<8xf32>
    %15 = vector.multi_reduction <add>, %14, %cst_9 [1] : vector<8x32xf32> to vector<8xf32>
    %16 = vector.shape_cast %15 : vector<8xf32> to vector<8x1xf32>
    %cst_10 = arith.constant 3.200000e+01 : f32
    %17 = vector.broadcast %cst_10 : f32 to vector<8x1xf32>
    %18 = arith.divf %16, %17 : vector<8x1xf32>
    %19 = vector.broadcast %11 : vector<8x1xf32> to vector<8x32xf32>
    %20 = arith.subf %3, %19 : vector<8x32xf32>
    %cst_11 = arith.constant 9.99999974E-6 : f32
    %21 = vector.broadcast %cst_11 : f32 to vector<8x1xf32>
    %22 = arith.addf %18, %21 : vector<8x1xf32>
    %23 = math.rsqrt %22 : vector<8x1xf32>
    %24 = vector.broadcast %23 : vector<8x1xf32> to vector<8x32xf32>
    %25 = arith.mulf %20, %24 : vector<8x32xf32>
    %26 = vector.broadcast %5 : vector<1x32xf32> to vector<8x32xf32>
    %27 = arith.mulf %25, %26 : vector<8x32xf32>
    %28 = vector.broadcast %7 : vector<1x32xf32> to vector<8x32xf32>
    %29 = arith.addf %27, %28 : vector<8x32xf32>
    %30 = arith.truncf %29 : vector<8x32xf32> to vector<8x32xbf16>
    %c0_12 = arith.constant 0 : index
    %c0_13 = arith.constant 0 : index
    %c0_14 = arith.constant 0 : index
    %31 = vector.load %arg6[%c0_12, %c0_13, %c0_14] : memref<1x32x48xbf16, #tpu.memory_space<vmem>>, vector<1x32x48xbf16>
    %32 = vector.shape_cast %31 : vector<1x32x48xbf16> to vector<32x48xbf16>
    %cst_15 = arith.constant dense<0.000000e+00> : vector<8x48xf32>
    %33 = tpu.matmul %30, %32, %cst_15 {dimension_numbers = #tpu.dot_dimension_numbers<[1], [0], [0], [1], [0, 0, 1, 1], [], []>} : vector<8x32xbf16>, vector<32x48xbf16>, vector<8x48xf32> -> vector<8x48xf32>
    %34 = vector.extract_strided_slice %33 {offsets = [0, 0], sizes = [8, 16], strides = [1, 1]} : vector<8x48xf32> to vector<8x16xf32>
    %35 = vector.extract_strided_slice %33 {offsets = [0, 16], sizes = [8, 16], strides = [1, 1]} : vector<8x48xf32> to vector<8x16xf32>
    %36 = vector.extract_strided_slice %33 {offsets = [0, 32], sizes = [8, 16], strides = [1, 1]} : vector<8x48xf32> to vector<8x16xf32>
    %c0_16 = arith.constant 0 : index
    %c0_17 = arith.constant 0 : index
    %37 = vector.load %arg3[%c0_16, %c0_17] : memref<8x8xf32, #tpu.memory_space<vmem>>, vector<8x8xf32>
    %38 = vector.shape_cast %37 : vector<8x8xf32> to vector<1x8x8xf32>
    %39 = vector.extract_strided_slice %34 {offsets = [0, 0], sizes = [8, 8], strides = [1, 1]} : vector<8x16xf32> to vector<8x8xf32>
    %40 = vector.shape_cast %39 : vector<8x8xf32> to vector<1x8x8xf32>
    %41 = arith.truncf %40 : vector<1x8x8xf32> to vector<1x8x8xbf16>
    %42 = vector.extract_strided_slice %35 {offsets = [0, 0], sizes = [8, 8], strides = [1, 1]} : vector<8x16xf32> to vector<8x8xf32>
    %43 = vector.shape_cast %42 : vector<8x8xf32> to vector<1x8x8xf32>
    %44 = arith.truncf %43 : vector<1x8x8xf32> to vector<1x8x8xbf16>
    %45 = vector.extract_strided_slice %36 {offsets = [0, 0], sizes = [8, 8], strides = [1, 1]} : vector<8x16xf32> to vector<8x8xf32>
    %46 = vector.shape_cast %45 : vector<8x8xf32> to vector<1x8x8xf32>
    %47 = arith.truncf %46 : vector<1x8x8xf32> to vector<1x8x8xbf16>
    "tpu.trace_start"() <{level = 10 : i32, message = "bnd,bmd->bnm"}> : () -> ()
    %cst_18 = arith.constant dense<0.000000e+00> : vector<1x8x8xf32>
    %48 = tpu.matmul %41, %44, %cst_18 {dimension_numbers = #tpu.dot_dimension_numbers<[2], [2], [1], [1], [0, 0, 0, 1, 1, 1], [0], [0]>} : vector<1x8x8xbf16>, vector<1x8x8xbf16>, vector<1x8x8xf32> -> vector<1x8x8xf32>
    "tpu.trace_stop"() : () -> ()
    %cst_19 = arith.constant dense<0xFF800000> : vector<1x8xf32>
    %49 = vector.multi_reduction <maximumf>, %48, %cst_19 [2] : vector<1x8x8xf32> to vector<1x8xf32>
    %50 = vector.shape_cast %49 : vector<1x8xf32> to vector<1x8x1xf32>
    %51 = vector.broadcast %50 : vector<1x8x1xf32> to vector<1x8x8xf32>
    %52 = arith.subf %48, %51 : vector<1x8x8xf32>
    %53 = math.exp %52 : vector<1x8x8xf32>
    %cst_20 = arith.constant dense<0.000000e+00> : vector<1x8xf32>
    %54 = vector.multi_reduction <add>, %53, %cst_20 [2] : vector<1x8x8xf32> to vector<1x8xf32>
    %55 = vector.shape_cast %54 : vector<1x8xf32> to vector<1x8x1xf32>
    %56 = tpu.reciprocal %55 {approx = true} : vector<1x8x1xf32> -> vector<1x8x1xf32>
    %57 = vector.broadcast %56 : vector<1x8x1xf32> to vector<1x8x8xf32>
    %58 = arith.mulf %53, %57 : vector<1x8x8xf32>
    %59 = arith.addf %58, %38 : vector<1x8x8xf32>
    %60 = arith.truncf %59 : vector<1x8x8xf32> to vector<1x8x8xbf16>
    "tpu.trace_start"() <{level = 10 : i32, message = "bnm,bmd->bnd"}> : () -> ()
    %cst_21 = arith.constant dense<0.000000e+00> : vector<1x8x8xf32>
    %61 = tpu.matmul %60, %47, %cst_21 {dimension_numbers = #tpu.dot_dimension_numbers<[2], [1], [1], [2], [0, 0, 0, 1, 1, 2], [0], [0]>} : vector<1x8x8xbf16>, vector<1x8x8xbf16>, vector<1x8x8xf32> -> vector<1x8x8xf32>
    "tpu.trace_stop"() : () -> ()
    %62 = vector.shape_cast %61 : vector<1x8x8xf32> to vector<8x8xf32>
    %c0_22 = arith.constant 0 : index
    %c0_23 = arith.constant 0 : index
    %63 = vector.load %arg21[%c0_22, %c0_23] : memref<8x16xf32, #tpu.memory_space<vmem>>, vector<8x8xf32>
    tpu.vector_store %arg21[%c0_22, %c0_23], %62 {strides = array<i32>} : memref<8x16xf32, #tpu.memory_space<vmem>>, vector<8x8xf32>,
    %64 = vector.extract_strided_slice %34 {offsets = [0, 8], sizes = [8, 8], strides = [1, 1]} : vector<8x16xf32> to vector<8x8xf32>
    %65 = vector.shape_cast %64 : vector<8x8xf32> to vector<1x8x8xf32>
    %66 = arith.truncf %65 : vector<1x8x8xf32> to vector<1x8x8xbf16>
    %67 = vector.extract_strided_slice %35 {offsets = [0, 8], sizes = [8, 8], strides = [1, 1]} : vector<8x16xf32> to vector<8x8xf32>
    %68 = vector.shape_cast %67 : vector<8x8xf32> to vector<1x8x8xf32>
    %69 = arith.truncf %68 : vector<1x8x8xf32> to vector<1x8x8xbf16>
    %70 = vector.extract_strided_slice %36 {offsets = [0, 8], sizes = [8, 8], strides = [1, 1]} : vector<8x16xf32> to vector<8x8xf32>
    %71 = vector.shape_cast %70 : vector<8x8xf32> to vector<1x8x8xf32>
    %72 = arith.truncf %71 : vector<1x8x8xf32> to vector<1x8x8xbf16>
    "tpu.trace_start"() <{level = 10 : i32, message = "bnd,bmd->bnm"}> : () -> ()
    %cst_24 = arith.constant dense<0.000000e+00> : vector<1x8x8xf32>
    %73 = tpu.matmul %66, %69, %cst_24 {dimension_numbers = #tpu.dot_dimension_numbers<[2], [2], [1], [1], [0, 0, 0, 1, 1, 1], [0], [0]>} : vector<1x8x8xbf16>, vector<1x8x8xbf16>, vector<1x8x8xf32> -> vector<1x8x8xf32>
    "tpu.trace_stop"() : () -> ()
    %cst_25 = arith.constant dense<0xFF800000> : vector<1x8xf32>
    %74 = vector.multi_reduction <maximumf>, %73, %cst_25 [2] : vector<1x8x8xf32> to vector<1x8xf32>
    %75 = vector.shape_cast %74 : vector<1x8xf32> to vector<1x8x1xf32>
    %76 = vector.broadcast %75 : vector<1x8x1xf32> to vector<1x8x8xf32>
    %77 = arith.subf %73, %76 : vector<1x8x8xf32>
    %78 = math.exp %77 : vector<1x8x8xf32>
    %cst_26 = arith.constant dense<0.000000e+00> : vector<1x8xf32>
    %79 = vector.multi_reduction <add>, %78, %cst_26 [2] : vector<1x8x8xf32> to vector<1x8xf32>
    %80 = vector.shape_cast %79 : vector<1x8xf32> to vector<1x8x1xf32>
    %81 = tpu.reciprocal %80 {approx = true} : vector<1x8x1xf32> -> vector<1x8x1xf32>
    %82 = vector.broadcast %81 : vector<1x8x1xf32> to vector<1x8x8xf32>
    %83 = arith.mulf %78, %82 : vector<1x8x8xf32>
    %84 = arith.addf %83, %38 : vector<1x8x8xf32>
    %85 = arith.truncf %84 : vector<1x8x8xf32> to vector<1x8x8xbf16>
    "tpu.trace_start"() <{level = 10 : i32, message = "bnm,bmd->bnd"}> : () -> ()
    %cst_27 = arith.constant dense<0.000000e+00> : vector<1x8x8xf32>
    %86 = tpu.matmul %85, %72, %cst_27 {dimension_numbers = #tpu.dot_dimension_numbers<[2], [1], [1], [2], [0, 0, 0, 1, 1, 2], [0], [0]>} : vector<1x8x8xbf16>, vector<1x8x8xbf16>, vector<1x8x8xf32> -> vector<1x8x8xf32>
    "tpu.trace_stop"() : () -> ()
    %87 = vector.shape_cast %86 : vector<1x8x8xf32> to vector<8x8xf32>
    %c0_28 = arith.constant 0 : index
    %c8 = arith.constant 8 : index
    %88 = vector.load %arg21[%c0_28, %c8] : memref<8x16xf32, #tpu.memory_space<vmem>>, vector<8x8xf32>
    tpu.vector_store %arg21[%c0_28, %c8], %87 {strides = array<i32>} : memref<8x16xf32, #tpu.memory_space<vmem>>, vector<8x8xf32>,
    %c0_29 = arith.constant 0 : index
    %c0_30 = arith.constant 0 : index
    %89 = vector.load %arg21[%c0_29, %c0_30] : memref<8x16xf32, #tpu.memory_space<vmem>>, vector<8x16xf32>
    %90 = arith.truncf %89 : vector<8x16xf32> to vector<8x16xbf16>
    %c0_31 = arith.constant 0 : index
    %c0_32 = arith.constant 0 : index
    %c0_33 = arith.constant 0 : index
    %91 = vector.load %arg7[%c0_31, %c0_32, %c0_33] : memref<1x16x32xbf16, #tpu.memory_space<vmem>>, vector<1x16x32xbf16>
    %92 = vector.shape_cast %91 : vector<1x16x32xbf16> to vector<16x32xbf16>
    %cst_34 = arith.constant dense<0.000000e+00> : vector<8x32xf32>
    %93 = tpu.matmul %90, %92, %cst_34 {dimension_numbers = #tpu.dot_dimension_numbers<[1], [0], [0], [1], [0, 0, 1, 1], [], []>} : vector<8x16xbf16>, vector<16x32xbf16>, vector<8x32xf32> -> vector<8x32xf32>
    %94 = arith.addf %3, %93 : vector<8x32xf32>
    %c0_35 = arith.constant 0 : index
    %c0_36 = arith.constant 0 : index
    %c0_37 = arith.constant 0 : index
    %95 = vector.load %arg8[%c0_35, %c0_36, %c0_37] : memref<1x1x32xf32, #tpu.memory_space<vmem>>, vector<1x1x32xf32>
    %96 = vector.shape_cast %95 : vector<1x1x32xf32> to vector<1x32xf32>
    %97 = vector.broadcast %96 : vector<1x32xf32> to vector<8x32xf32>
    %98 = arith.addf %94, %97 : vector<8x32xf32>
    %c0_38 = arith.constant 0 : index
    %c0_39 = arith.constant 0 : index
    %c0_40 = arith.constant 0 : index
    %99 = vector.load %arg9[%c0_38, %c0_39, %c0_40] : memref<1x1x32xf32, #tpu.memory_space<vmem>>, vector<1x1x32xf32>
    %100 = vector.shape_cast %99 : vector<1x1x32xf32> to vector<1x32xf32>
    %c0_41 = arith.constant 0 : index
    %c0_42 = arith.constant 0 : index
    %c0_43 = arith.constant 0 : index
    %101 = vector.load %arg10[%c0_41, %c0_42, %c0_43] : memref<1x1x32xf32, #tpu.memory_space<vmem>>, vector<1x1x32xf32>
    %102 = vector.shape_cast %101 : vector<1x1x32xf32> to vector<1x32xf32>
    %cst_44 = arith.constant dense<0.000000e+00> : vector<8xf32>
    %103 = vector.multi_reduction <add>, %98, %cst_44 [1] : vector<8x32xf32> to vector<8xf32>
    %104 = vector.shape_cast %103 : vector<8xf32> to vector<8x1xf32>
    %cst_45 = arith.constant 3.200000e+01 : f32
    %105 = vector.broadcast %cst_45 : f32 to vector<8x1xf32>
    %106 = arith.divf %104, %105 : vector<8x1xf32>
    %107 = vector.broadcast %106 : vector<8x1xf32> to vector<8x32xf32>
    %108 = arith.subf %98, %107 : vector<8x32xf32>
    %109 = arith.mulf %108, %108 : vector<8x32xf32>
    %cst_46 = arith.constant dense<0.000000e+00> : vector<8xf32>
    %110 = vector.multi_reduction <add>, %109, %cst_46 [1] : vector<8x32xf32> to vector<8xf32>
    %111 = vector.shape_cast %110 : vector<8xf32> to vector<8x1xf32>
    %cst_47 = arith.constant 3.200000e+01 : f32
    %112 = vector.broadcast %cst_47 : f32 to vector<8x1xf32>
    %113 = arith.divf %111, %112 : vector<8x1xf32>
    %114 = vector.broadcast %106 : vector<8x1xf32> to vector<8x32xf32>
    %115 = arith.subf %98, %114 : vector<8x32xf32>
    %cst_48 = arith.constant 9.99999974E-6 : f32
    %116 = vector.broadcast %cst_48 : f32 to vector<8x1xf32>
    %117 = arith.addf %113, %116 : vector<8x1xf32>
    %118 = math.rsqrt %117 : vector<8x1xf32>
    %119 = vector.broadcast %118 : vector<8x1xf32> to vector<8x32xf32>
    %120 = arith.mulf %115, %119 : vector<8x32xf32>
    %121 = vector.broadcast %100 : vector<1x32xf32> to vector<8x32xf32>
    %122 = arith.mulf %120, %121 : vector<8x32xf32>
    %123 = vector.broadcast %102 : vector<1x32xf32> to vector<8x32xf32>
    %124 = arith.addf %122, %123 : vector<8x32xf32>
    %125 = arith.truncf %124 : vector<8x32xf32> to vector<8x32xbf16>
    %c0_49 = arith.constant 0 : index
    %c0_50 = arith.constant 0 : index
    %c0_51 = arith.constant 0 : index
    %126 = vector.load %arg11[%c0_49, %c0_50, %c0_51] : memref<1x32x64xbf16, #tpu.memory_space<vmem>>, vector<1x32x64xbf16>
    %127 = vector.shape_cast %126 : vector<1x32x64xbf16> to vector<32x64xbf16>
    %cst_52 = arith.constant dense<0.000000e+00> : vector<8x64xf32>
    %128 = tpu.matmul %125, %127, %cst_52 {dimension_numbers = #tpu.dot_dimension_numbers<[1], [0], [0], [1], [0, 0, 1, 1], [], []>} : vector<8x32xbf16>, vector<32x64xbf16>, vector<8x64xf32> -> vector<8x64xf32>
    %c0_53 = arith.constant 0 : index
    %c0_54 = arith.constant 0 : index
    %c0_55 = arith.constant 0 : index
    %129 = vector.load %arg12[%c0_53, %c0_54, %c0_55] : memref<1x1x64xf32, #tpu.memory_space<vmem>>, vector<1x1x64xf32>
    %130 = vector.shape_cast %129 : vector<1x1x64xf32> to vector<1x64xf32>
    %131 = vector.broadcast %130 : vector<1x64xf32> to vector<8x64xf32>
    %132 = arith.addf %128, %131 : vector<8x64xf32>
    %cst_56 = arith.constant 5.000000e-01 : f32
    %133 = vector.broadcast %cst_56 : f32 to vector<8x64xf32>
    %134 = arith.mulf %133, %132 : vector<8x64xf32>
    %cst_57 = arith.constant 0.707106769 : f32
    %135 = vector.broadcast %cst_57 : f32 to vector<8x64xf32>
    %136 = arith.mulf %132, %135 : vector<8x64xf32>
    %137 = math.erf %136 : vector<8x64xf32>
    %cst_58 = arith.constant 1.000000e+00 : f32
    %138 = vector.broadcast %cst_58 : f32 to vector<8x64xf32>
    %139 = arith.addf %138, %137 : vector<8x64xf32>
    %140 = arith.mulf %134, %139 : vector<8x64xf32>
    %141 = arith.truncf %140 : vector<8x64xf32> to vector<8x64xbf16>
    %c0_59 = arith.constant 0 : index
    %c0_60 = arith.constant 0 : index
    %c0_61 = arith.constant 0 : index
    %142 = vector.load %arg13[%c0_59, %c0_60, %c0_61] : memref<1x64x32xbf16, #tpu.memory_space<vmem>>, vector<1x64x32xbf16>
    %143 = vector.shape_cast %142 : vector<1x64x32xbf16> to vector<64x32xbf16>
    %cst_62 = arith.constant dense<0.000000e+00> : vector<8x32xf32>
    %144 = tpu.matmul %141, %143, %cst_62 {dimension_numbers = #tpu.dot_dimension_numbers<[1], [0], [0], [1], [0, 0, 1, 1], [], []>} : vector<8x64xbf16>, vector<64x32xbf16>, vector<8x32xf32> -> vector<8x32xf32>
    %c0_63 = arith.constant 0 : index
    %c0_64 = arith.constant 0 : index
    %c0_65 = arith.constant 0 : index
    %145 = vector.load %arg14[%c0_63, %c0_64, %c0_65] : memref<1x1x32xf32, #tpu.memory_space<vmem>>, vector<1x1x32xf32>
    %146 = vector.shape_cast %145 : vector<1x1x32xf32> to vector<1x32xf32>
    %147 = vector.broadcast %146 : vector<1x32xf32> to vector<8x32xf32>
    %148 = arith.addf %144, %147 : vector<8x32xf32>
    %149 = arith.addf %98, %148 : vector<8x32xf32>
    %c0_66 = arith.constant 0 : index
    %c0_67 = arith.constant 0 : index
    %150 = vector.load %arg20[%c0_66, %c0_67] : memref<8x32xf32, #tpu.memory_space<vmem>>, vector<8x32xf32>
    tpu.vector_store %arg20[%c0_66, %c0_67], %149 {strides = array<i32>} : memref<8x32xf32, #tpu.memory_space<vmem>>, vector<8x32xf32>,
    %c1_i32 = arith.constant 1 : i32
    %151 = arith.cmpi eq, %arg1, %c1_i32 : i32
    %152 = arith.extui %151 : i1 to i32
    %c0_i32_68 = arith.constant 0 : i32
    %153 = arith.cmpi ne, %152, %c0_i32_68 : i32
    scf.if %153 {
      %c0_69 = arith.constant 0 : index
      %c0_70 = arith.constant 0 : index
      %154 = vector.load %arg15[%c0_69, %c0_70] : memref<1x32xf32, #tpu.memory_space<vmem>>, vector<1x32xf32>
      %c0_71 = arith.constant 0 : index
      %c0_72 = arith.constant 0 : index
      %155 = vector.load %arg16[%c0_71, %c0_72] : memref<1x32xf32, #tpu.memory_space<vmem>>, vector<1x32xf32>
      %cst_73 = arith.constant dense<0.000000e+00> : vector<8xf32>
      %156 = vector.multi_reduction <add>, %149, %cst_73 [1] : vector<8x32xf32> to vector<8xf32>
      %157 = vector.shape_cast %156 : vector<8xf32> to vector<8x1xf32>
      %cst_74 = arith.constant 3.200000e+01 : f32
      %158 = vector.broadcast %cst_74 : f32 to vector<8x1xf32>
      %159 = arith.divf %157, %158 : vector<8x1xf32>
      %160 = vector.broadcast %159 : vector<8x1xf32> to vector<8x32xf32>
      %161 = arith.subf %149, %160 : vector<8x32xf32>
      %162 = arith.mulf %161, %161 : vector<8x32xf32>
      %cst_75 = arith.constant dense<0.000000e+00> : vector<8xf32>
      %163 = vector.multi_reduction <add>, %162, %cst_75 [1] : vector<8x32xf32> to vector<8xf32>
      %164 = vector.shape_cast %163 : vector<8xf32> to vector<8x1xf32>
      %cst_76 = arith.constant 3.200000e+01 : f32
      %165 = vector.broadcast %cst_76 : f32 to vector<8x1xf32>
      %166 = arith.divf %164, %165 : vector<8x1xf32>
      %167 = vector.broadcast %159 : vector<8x1xf32> to vector<8x32xf32>
      %168 = arith.subf %149, %167 : vector<8x32xf32>
      %cst_77 = arith.constant 9.99999974E-6 : f32
      %169 = vector.broadcast %cst_77 : f32 to vector<8x1xf32>
      %170 = arith.addf %166, %169 : vector<8x1xf32>
      %171 = math.rsqrt %170 : vector<8x1xf32>
      %172 = vector.broadcast %171 : vector<8x1xf32> to vector<8x32xf32>
      %173 = arith.mulf %168, %172 : vector<8x32xf32>
      %174 = vector.broadcast %154 : vector<1x32xf32> to vector<8x32xf32>
      %175 = arith.mulf %173, %174 : vector<8x32xf32>
      %176 = vector.broadcast %155 : vector<1x32xf32> to vector<8x32xf32>
      %177 = arith.addf %175, %176 : vector<8x32xf32>
      %178 = arith.truncf %177 : vector<8x32xf32> to vector<8x32xbf16>
      %c0_78 = arith.constant 0 : index
      %c0_79 = arith.constant 0 : index
      %179 = vector.load %arg17[%c0_78, %c0_79] : memref<32x128xbf16, #tpu.memory_space<vmem>>, vector<32x128xbf16>
      %cst_80 = arith.constant dense<0.000000e+00> : vector<8x128xf32>
      %180 = tpu.matmul %178, %179, %cst_80 {dimension_numbers = #tpu.dot_dimension_numbers<[1], [0], [0], [1], [0, 0, 1, 1], [], []>} : vector<8x32xbf16>, vector<32x128xbf16>, vector<8x128xf32> -> vector<8x128xf32>
      %c0_81 = arith.constant 0 : index
      %c0_82 = arith.constant 0 : index
      %181 = vector.load %arg18[%c0_81, %c0_82] : memref<1x128xf32, #tpu.memory_space<vmem>>, vector<1x128xf32>
      %182 = vector.broadcast %181 : vector<1x128xf32> to vector<8x128xf32>
      %183 = arith.addf %180, %182 : vector<8x128xf32>
      %c0_83 = arith.constant 0 : index
      %c0_84 = arith.constant 0 : index
      %184 = vector.load %arg19[%c0_83, %c0_84] : memref<8x128xf32, #tpu.memory_space<vmem>>, vector<8x128xf32>
      tpu.vector_store %arg19[%c0_83, %c0_84], %183 {strides = array<i32>} : memref<8x128xf32, #tpu.memory_space<vmem>>, vector<8x128xf32>,
    } else {
    }
    return
  }
  func.func @transform_1(%arg0: i32, %arg1: i32) -> (i32, i32) {
    %c0_i32 = arith.constant 0 : i32
    %c0_i32_0 = arith.constant 0 : i32
    %c0_i32_1 = arith.constant 0 : i32
    return %c0_i32, %c0_i32_0 : i32, i32
  }
  func.func @transform_2(%arg0: i32, %arg1: i32) -> (i32, i32, i32) {
    %c0_i32 = arith.constant 0 : i32
    %c0_i32_0 = arith.constant 0 : i32
    %c0_i32_1 = arith.constant 0 : i32
    return %arg1, %c0_i32, %c0_i32_0 : i32, i32, i32
  }
  func.func @transform_3(%arg0: i32, %arg1: i32) -> (i32, i32, i32) {
    %c0_i32 = arith.constant 0 : i32
    %c0_i32_0 = arith.constant 0 : i32
    %c0_i32_1 = arith.constant 0 : i32
    return %arg1, %c0_i32, %c0_i32_0 : i32, i32, i32
  }
  func.func @transform_4(%arg0: i32, %arg1: i32) -> (i32, i32, i32) {
    %c0_i32 = arith.constant 0 : i32
    %c0_i32_0 = arith.constant 0 : i32
    %c0_i32_1 = arith.constant 0 : i32
    return %arg1, %c0_i32, %c0_i32_0 : i32, i32, i32
  }
  func.func @transform_5(%arg0: i32, %arg1: i32) -> (i32, i32, i32) {
    %c0_i32 = arith.constant 0 : i32
    %c0_i32_0 = arith.constant 0 : i32
    %c0_i32_1 = arith.constant 0 : i32
    return %arg1, %c0_i32, %c0_i32_0 : i32, i32, i32
  }
  func.func @transform_6(%arg0: i32, %arg1: i32) -> (i32, i32, i32) {
    %c0_i32 = arith.constant 0 : i32
    %c0_i32_0 = arith.constant 0 : i32
    %c0_i32_1 = arith.constant 0 : i32
    return %arg1, %c0_i32, %c0_i32_0 : i32, i32, i32
  }
  func.func @transform_7(%arg0: i32, %arg1: i32) -> (i32, i32, i32) {
    %c0_i32 = arith.constant 0 : i32
    %c0_i32_0 = arith.constant 0 : i32
    %c0_i32_1 = arith.constant 0 : i32
    return %arg1, %c0_i32, %c0_i32_0 : i32, i32, i32
  }
  func.func @transform_8(%arg0: i32, %arg1: i32) -> (i32, i32, i32) {
    %c0_i32 = arith.constant 0 : i32
    %c0_i32_0 = arith.constant 0 : i32
    %c0_i32_1 = arith.constant 0 : i32
    return %arg1, %c0_i32, %c0_i32_0 : i32, i32, i32
  }
  func.func @transform_9(%arg0: i32, %arg1: i32) -> (i32, i32, i32) {
    %c0_i32 = arith.constant 0 : i32
    %c0_i32_0 = arith.constant 0 : i32
    %c0_i32_1 = arith.constant 0 : i32
    return %arg1, %c0_i32, %c0_i32_0 : i32, i32, i32
  }
  func.func @transform_10(%arg0: i32, %arg1: i32) -> (i32, i32, i32) {
    %c0_i32 = arith.constant 0 : i32
    %c0_i32_0 = arith.constant 0 : i32
    %c0_i32_1 = arith.constant 0 : i32
    return %arg1, %c0_i32, %c0_i32_0 : i32, i32, i32
  }
  func.func @transform_11(%arg0: i32, %arg1: i32) -> (i32, i32, i32) {
    %c0_i32 = arith.constant 0 : i32
    %c0_i32_0 = arith.constant 0 : i32
    %c0_i32_1 = arith.constant 0 : i32
    return %arg1, %c0_i32, %c0_i32_0 : i32, i32, i32
  }
  func.func @transform_12(%arg0: i32, %arg1: i32) -> (i32, i32, i32) {
    %c0_i32 = arith.constant 0 : i32
    %c0_i32_0 = arith.constant 0 : i32
    %c0_i32_1 = arith.constant 0 : i32
    return %arg1, %c0_i32, %c0_i32_0 : i32, i32, i32
  }
  func.func @transform_13(%arg0: i32, %arg1: i32) -> (i32, i32) {
    %c0_i32 = arith.constant 0 : i32
    %c0_i32_0 = arith.constant 0 : i32
    %c0_i32_1 = arith.constant 0 : i32
    return %c0_i32, %c0_i32_0 : i32, i32
  }
  func.func @transform_14(%arg0: i32, %arg1: i32) -> (i32, i32) {
    %c0_i32 = arith.constant 0 : i32
    %c0_i32_0 = arith.constant 0 : i32
    %c0_i32_1 = arith.constant 0 : i32
    return %c0_i32, %c0_i32_0 : i32, i32
  }
  func.func @transform_15(%arg0: i32, %arg1: i32) -> (i32, i32) {
    %c0_i32 = arith.constant 0 : i32
    %c0_i32_0 = arith.constant 0 : i32
    %c0_i32_1 = arith.constant 0 : i32
    return %c0_i32, %c0_i32_0 : i32, i32
  }
  func.func @transform_16(%arg0: i32, %arg1: i32) -> (i32, i32) {
    %c0_i32 = arith.constant 0 : i32
    %c0_i32_0 = arith.constant 0 : i32
    %c0_i32_1 = arith.constant 0 : i32
    return %c0_i32, %c0_i32_0 : i32, i32
  }
  func.func @transform_17(%arg0: i32, %arg1: i32) -> (i32, i32) {
    %c0_i32 = arith.constant 0 : i32
    %c0_i32_0 = arith.constant 0 : i32
    return %arg0, %c0_i32 : i32, i32
  }
}

</mosaic_0001>

<bundles_post_ra>
// kernel: vit_forward.1
= control target key start
LH: loop header
LB: loop body
LE: loop exit
PB: predicated region body
PF: predicated region fallthrough
CT: control target
= control target key end

     0   :  { %s3427_s0 = inlined_call_operand.vmem [shape: f32[16,32], index: 0, kind: input, shape index: {}]   ;;  %s3428_s1 = inlined_call_operand.vmem [shape: f32[8,8], index: 1, kind: input, shape index: {}]   ;;  %s3429_s2 = inlined_call_operand.hbm [shape: f32[2,1,32], index: 2, kind: input, shape index: {}]   ;;  %s3430_s3 = inlined_call_operand.hbm [shape: f32[2,1,32], index: 3, kind: input, shape index: {}]   ;;  %s3431_s4 = inlined_call_operand.vmem [shape: bf16[2,32,48], index: 4, kind: input, shape index: {}]   ;;  %s3432_s5 = inlined_call_operand.vmem [shape: bf16[2,16,32], index: 5, kind: input, shape index: {}]   ;;  %s3433_s6 = inlined_call_operand.hbm [shape: f32[2,1,32], index: 6, kind: input, shape index: {}]   ;;  %s3434_s7 = inlined_call_operand.hbm [shape: f32[2,1,32], index: 7, kind: input, shape index: {}]   ;;  %s3435_s8 = inlined_call_operand.hbm [shape: f32[2,1,32], index: 8, kind: input, shape index: {}]   ;;  %s3436_s9 = inlined_call_operand.vmem [shape: bf16[2,32,64], index: 9, kind: input, shape index: {}]   ;;  %s3437_s10 = inlined_call_operand.hbm [shape: f32[2,1,64], index: 10, kind: input, shape index: {}]   ;;  %s3438_s11 = inlined_call_operand.vmem [shape: bf16[2,64,32], index: 11, kind: input, shape index: {}]   ;;  %s3439_s12 = inlined_call_operand.hbm [shape: f32[2,1,32], index: 12, kind: input, shape index: {}]   ;;  %s3440_s13 = inlined_call_operand.hbm [shape: f32[1,32], index: 13, kind: input, shape index: {}]   ;;  %s3441_s14 = inlined_call_operand.hbm [shape: f32[1,32], index: 14, kind: input, shape index: {}]   ;;  %s3442_s15 = inlined_call_operand.vmem [shape: bf16[32,128], index: 15, kind: input, shape index: {}]   ;;  %s3443_s16 = inlined_call_operand.hbm [shape: f32[1,128], index: 16, kind: input, shape index: {}]   ;;  %s3444_s17 = inlined_call_operand.hbm [shape: f32[16,128], index: 17, kind: output, shape index: {}]  }
   0x1   :  { %3481 = sst [smem:[#allocation47_spill]] %s3427_s0 }
   0x2   :  { %3482 = sst [smem:[#allocation48_spill]] %s3428_s1 }
   0x3   :  { %3483 = sst [smem:[#allocation49_spill]] %s3429_s2 }
   0x4   :  { %3484 = sst [smem:[#allocation50_spill]] %s3430_s3 }
   0x5   :  { %3485 = sst [smem:[#allocation51_spill]] %s3431_s4 }
   0x6   :  { %3486 = sst [smem:[#allocation52_spill]] %s3432_s5 }
   0x7   :  { %3487 = sst [smem:[#allocation53_spill]] %s3433_s6 }
   0x8   :  { %3488 = sst [smem:[#allocation54_spill]] %s3434_s7 }
   0x9   :  { %3489 = sst [smem:[#allocation55_spill]] %s3435_s8 }
   0xa   :  { %3490 = sst [smem:[#allocation56_spill]] %s3436_s9 }
   0xb   :  { %3491 = sst [smem:[#allocation57_spill]] %s3438_s11 }
   0xc   :  { %3492 = sst [smem:[#allocation58_spill]] %s3440_s13 }
   0xd   :  { %3493 = sst [smem:[#allocation59_spill]] %s3442_s15 }
   0xe   :  { %3494 = sst [smem:[#allocation60_spill]] %s3444_s17 }
   0xf   :  { %22 = vsyncpa [#allocation6], 0 }
  0x10   :  { %24 = vsyncpa [#allocation6 + $0x1], 0 }
  0x11   :  { %25 = vsyncpa [#allocation9], 0 }
  0x12   :  { %27 = vsyncpa [#allocation9 + $0x1], 0 }
  0x13   :  { %28 = vsyncpa [#allocation12], 0 }
  0x14   :  { %30 = vsyncpa [#allocation12 + $0x1], 0 }
  0x15   :  { %31 = vsyncpa [#allocation15], 0 }
  0x16   :  { %33 = vsyncpa [#allocation15 + $0x1], 0 }
  0x17   :  { %34 = vsyncpa [#allocation18], 0 }
  0x18   :  { %35 = vsyncpa [#allocation21], 0 }
  0x19   :  { %36 = vsyncpa [#allocation7], 0 }
  0x1a   :  { %38 = vsyncpa [#allocation7 + $0x1], 0  ;;  %s2793_s24 = smov 0   ;;  %s2795_s25 = smov 0  }
  0x1b   :  { %s2797_s26 = smov 0   ;;  %s2799_s27 = smov 0  }
  0x1c   :  { %s2801_s28 = smov 0   ;;  %s2803_s29 = smov 0  }
  0x1d   :  { %s2805_s0 = smov 0   ;;  %s2807_s30 = smov 0  }
  0x1e   :  { %s2809_s18 = smov 0   ;;  %s2811_s19 = smov 0  }
  0x1f   :  { %s2813_s1 = smov 0  }
  0x20 LB: > { %3495 = sst [smem:[#allocation32_spill]] %s2640_s24  ;;  %s2847_s20 = sadd.s32 4294967295, %s2680_s1   ;;  %s2680_s1 = sphi %s2813_s1, %s44_s1   ;;  %s2676_s19 = sphi %s2811_s19, %s3585_s19   ;;  %s2672_s18 = sphi %s2809_s18, %s3584_s18   ;;  %s2668_s30 = sphi %s2807_s30, %s3583_s30   ;;  %s2664_s0 = sphi %s2805_s0, %s3582_s0   ;;  %s2660_s29 = sphi %s2803_s29, %s3581_s29   ;;  %s2656_s28 = sphi %s2801_s28, %s3589_s28   ;;  %s2652_s27 = sphi %s2799_s27, %s3588_s27   ;;  %s2648_s26 = sphi %s2797_s26, %s3587_s26   ;;  %s2644_s25 = sphi %s2795_s25, %s3586_s25   ;;  %s2640_s24 = sphi %s2793_s24, %s3579_s24  }
  0x21   : > { %3496 = sst [smem:[#allocation33_spill]] %s2644_s25  ;;  %s1884_s21 = sadd.s32 4294967294, %s2680_s1  }
  0x22   : > { %3497 = sst [smem:[#allocation34_spill]] %s2660_s29  ;;  %p91_p0 = scmp.ne.s32.totalorder %s2660_s29, %s2656_s28 }
  0x23   : > { %3498 = sst [smem:[#allocation35_spill]] %s2664_s0  ;;  %p92_p1 = scmp.eq.s32.totalorder %s2680_s1, 0 }
  0x24   : > { %3499 = sst [smem:[#allocation36_spill]] %s2668_s30  ;;  %p97_p2 = scmp.ne.s32.totalorder %s2656_s28, %s2652_s27 }
  0x25   : > { %3500 = sst [smem:[#allocation37_spill]] %s2672_s18  ;;  %p3452_p3 = scmp.eq.s32.totalorder %s2847_s20, 0 }
  0x26   : > { %3501 = sst [smem:[#allocation38_spill]] %s2676_s19  ;;  %p2857_p4 = por %p92_p1, %p91_p0 }
  0x27   : > { %3502 = sst [smem:[#allocation39_spill]] %s2680_s1  ;;  %p464_p5 = scmp.ne.s32.totalorder %s2648_s26, %s2644_s25 }
  0x28   : > { %3503 = sst [smem:[#allocation40_spill]] %s2847_s20  ;;  %p2865_p6 = por %p3452_p3, %p97_p2 }
  0x29   : > { %p465_p7 = scmp.eq.s32.totalorder %s2847_s20, 3  ;;  %p470_p8 = scmp.ne.s32.totalorder %s2644_s25, %s2640_s24 }
  0x2a   : > { %s3505_s15 = scalar_select %p2865_p6, 1, 0 }
  0x2b   : > { %p471_p9 = scmp.eq.s32.totalorder %s1884_s21, 3  ;;  %p2872_p10 = por %p465_p7, %p464_p5 }
  0x2c   : > { %3506 = sst [smem:[#allocation41_spill]] %s3505_s15  ;;  %p1885_p11 = scmp.ge.s32.totalorder %s2680_s1, 1 }
  0x2d   : > { %s3507_s27 = scalar_select %p2872_p10, 1, 0 }
  0x2e   : > { %p2877_p12 = por %p471_p9, %p470_p8  ;;  %p478_p13 = scmp.lt.s32.totalorder %s2680_s1, 5 }
  0x2f   : > { %3508 = sst [smem:[#allocation42_spill]] %s3507_s27  ;;  %s2682_s30 = smov [#allocation17]  }
  0x30   : > { %s3509_s23 = scalar_select %p2877_p12, 1, 0 }
  0x31   : > { %p2882_p0 = pnand %p1885_p11, %p478_p13  ;;  %s494_s11 = sshll.u32 %s2682_s30, 4  ;;  %s495_s11 = int_to_ptr.vmem [resolvable:$true] %s494_s11 }
  0x32   : > { %3510 = sst [smem:[#allocation43_spill]] %s3509_s23  ;;  %p2109_p2 = scmp.lt.s32.totalorder %s2680_s1, 4 }
  0x33   : > { %s3511_s22 = scalar_select %p2882_p0, 1, 0 }
  0x34   : > { %p2070_p1 = pneg %p2882_p0  ;;  %p2897_p7 = pnand %p2109_p2, %p2857_p4 }
  0x35   : > { %s3514_s13 = sld [smem:[#allocation58_spill]] }
  0x36   : > { %p2891_p5 = pnand %p2070_p1, %p3452_p3 }
  0x37   : > { %s3513_s23 = scalar_select %p2897_p7, 1, 0 }
  0x38   : > { %s3512_s21 = scalar_select %p2891_p5, 1, 0 }
  0x39   : > { %p2909_p9 = pneg %p2891_p5 }
  0x3b   : > { %s2242_s9 = scalar_lea.hbm %s3514_s13, 16 }
  0x3c   : > { %p2243_p8 = scmp.ne.s32.totalorder %s3514_s13, %s2242_s9  ;;  %p2249_p13 = scmp.lt.u32.totalorder %s2242_s9, %s3514_s13 }
  0x3d   : > { %s3515_s4 = scalar_select %p2909_p9, 1, 0 }
  0x3e   : > { %p2245_p11 = pnand %p2909_p9, %p2243_p8 }
  0x40   : > { %p2246_p4 = pneg %p2245_p11 }
  0x42   : > { %p2251_p1 = pnand %p2249_p13, %p2246_p4 }
  0x44   : > { %2254 = shalt.err (!%p2251_p1)
}
  0x45   : > { %s2255_s24 = scalar_lea.vmem %s495_s11, 16  ;;  %s2262_s5 = scalar_lea.vmem %s495_s11, 32 }
  0x46   : > { %p2256_p2 = scmp.ne.s32.totalorder %s495_s11, %s2255_s24  ;;  %p2263_p10 = scmp.lt.s32.totalorder %s495_s11, %s495_s11 }
  0x47   : > { %p2264_p6 = scmp.lt.s32.totalorder %s2262_s5, %s2255_s24 }
  0x48   : > { %p2258_p3 = pnand %p2256_p2, %p2909_p9 }
  0x49   : > { %p2265_p0 = por %p2264_p6, %p2263_p10 }
  0x4a   : > { %p2259_p12 = pneg %p2258_p3 }
  0x4c   : > { %p2266_p7 = pnand %p2265_p0, %p2259_p12 }
  0x4e   : > { %2269 = shalt.err (!%p2266_p7)
}
  0x4f   : > { %2073 = dma.hbm_to_vmem [thread:$0]  (!%p2891_p5), %s3514_s13, 16, %s495_s11, [#allocation18]  }
  0x50   : > { %s53_s9 = sadd.s32 1, %s2672_s18  ;;  %s56_s0 = sadd.s32 1, %s2676_s19 }
  0x51   : > { %p54_p3 = scmp.ge.s32.totalorder %s53_s9, 2  ;;  %s2928_s17 = sand.u32 1, %s2660_s29  }
  0x52   : > { %s2931_s24 = sshll.u32 %s2672_s18, 4  ;;  %s2934_s5 = sand.u32 1, %s2680_s1  }
  0x53   : > { %s3591_s9 = smov (%p54_p3, %s53_s9), 0  ;;  %s3593_s0 = smov (!%p54_p3, %s56_s0), %s2676_s19 }
  0x54   : > { %3516 = sst [smem:[#allocation44_spill]] %s3591_s9  ;;  %s81_s27 = ssub.s32 %s2672_s18, %s3591_s9 }
  0x55   : > { %p58_p6 = scmp.ge.s32.totalorder %s3593_s0, 2  ;;  %p82_p10 = scmp.eq.s32.totalorder %s81_s27, 0 }
  0x56   : > { %s3517_s3 = sld [smem:[#allocation50_spill]]  ;;  %s3519_s1 = sadd.s32 1, %s2660_s29 }
  0x57   : > { %s3595_s0 = smov (%p58_p6, %s3593_s0), 0  ;;  %s550_s15 = scalar_lea.vmem [#allocation8], %s2928_s17 }
  0x58   : > { %3518 = sst [smem:[#allocation45_spill]] %s3595_s0  ;;  %s451_s20 = ssub.s32 %s2676_s19, %s3595_s0 }
  0x59   : > { %s2952_s25 = scalar_select %p82_p10, %s2660_s29, %s3519_s1  }
  0x5a   : > { %s557_s9 = sshll.u32 %s550_s15, 4  ;;  %p2957_p12 = scmp.eq.s32.totalorder %s451_s20, 0  ;;  %s2961_s9 = int_to_ptr.vmem [resolvable:$true] %s557_s9 }
  0x5b   : > { %3520 = sst [smem:[#allocation46_spill]] %s2952_s25  ;;  %p3522_p7 = scmp.ne.s32.totalorder %s3513_s23, 0 }
  0x5c   : > { %s2945_s13 = scalar_lea.hbm %s3517_s3, %s2931_s24  ;;  %s2275_s20 = scalar_lea.hbm %s3517_s3, 32 }
  0x5d   : > { %s3521_s27 = scalar_select %p2957_p12, 1, 0 }
  0x5e   : > { %s2270_s30 = scalar_lea.hbm %s2945_s13, 16  ;;  %p2968_p8 = pneg %p3522_p7 }
  0x5f   : > { %p2271_p0 = scmp.ne.s32.totalorder %s2945_s13, %s2270_s30  ;;  %p2276_p13 = scmp.lt.u32.totalorder %s2945_s13, %s3517_s3 }
  0x60   : > { %s3523_s18 = scalar_select %p2968_p8, 1, 0 }
  0x61   : > { %p2273_p11 = pnand %p2968_p8, %p2271_p0  ;;  %p2277_p1 = scmp.lt.u32.totalorder %s2275_s20, %s2270_s30 }
  0x62   : > { %p2279_p3 = scmp.lt.u32.totalorder %s2270_s30, %s2945_s13 }
  0x63   : > { %p2274_p4 = pneg %p2273_p11  ;;  %p2278_p2 = por %p2277_p1, %p2276_p13 }
  0x65   : > { %p2280_p6 = por %p2279_p3, %p2278_p2 }
  0x67   : > { %p2281_p10 = pnand %p2280_p6, %p2274_p4 }
  0x69   : > { %2284 = shalt.err (!%p2281_p10)
}
  0x6a   : > { %s2285_s11 = scalar_lea.vmem %s2961_s9, 16  ;;  %s2683_s1 = smov [#allocation8]  }
  0x6b   : > { %p2286_p0 = scmp.ne.s32.totalorder %s2961_s9, %s2285_s11  ;;  %s2290_s15 = sshll.u32 %s2683_s1, 4  ;;  %s2291_s15 = int_to_ptr.vmem [resolvable:$false] %s2290_s15 }
  0x6c   : > { %s2292_s19 = scalar_lea.vmem %s2291_s15, 32  ;;  %p2293_p9 = scmp.lt.s32.totalorder %s2961_s9, %s2291_s15 }
  0x6d   : > { %p2288_p11 = pnand %p2286_p0, %p2968_p8  ;;  %p2294_p12 = scmp.lt.s32.totalorder %s2292_s19, %s2285_s11 }
  0x6f   : > { %p2289_p5 = pneg %p2288_p11  ;;  %p2295_p13 = por %p2294_p12, %p2293_p9 }
  0x71   : > { %p2296_p1 = pnand %p2295_p13, %p2289_p5 }
  0x73   : > { %2299 = shalt.err (!%p2296_p1)
}
  0x74   : > { %s3524_s0 = scalar_lea.sflag [#allocation9], %s2934_s5  ;;  %s3525_s30 = sadd.s32 1, %s2648_s26 }
  0x75   : > { %2086 = dma.hbm_to_vmem [thread:$0]  (!%p3522_p7), %s2945_s13, 16, %s2961_s9, %s3524_s0  }
  0x76   : > { %p3526_p4 = scmp.ne.s32.totalorder %s3521_s27, 0  ;;  %s3527_s7 = sld [smem:[#allocation54_spill]] }
  0x77   : > { %s600_s19 = scalar_lea.vmem [#allocation11], %s2928_s17  ;;  %s3475_s25 = scalar_lea.sflag [#allocation12], %s2934_s5 }
  0x78   : > { %s2998_s11 = scalar_select %p3526_p4, %s2648_s26, %s3525_s30  }
  0x79   : > { %s607_s3 = sshll.u32 %s600_s19, 4  ;;  %s608_s3 = int_to_ptr.vmem [resolvable:$true] %s607_s3 }
  0x7c   : > { %s3004_s15 = scalar_lea.hbm %s3527_s7, %s2931_s24  ;;  %s2305_s27 = scalar_lea.hbm %s3527_s7, 32 }
  0x7d   : > { %s2300_s29 = scalar_lea.hbm %s3004_s15, 16  ;;  %p2306_p2 = scmp.lt.u32.totalorder %s3004_s15, %s3527_s7 }
  0x7e   : > { %p2301_p5 = scmp.ne.s32.totalorder %s3004_s15, %s2300_s29  ;;  %p2307_p3 = scmp.lt.u32.totalorder %s2305_s27, %s2300_s29 }
  0x7f   : > { %p2309_p10 = scmp.lt.u32.totalorder %s2300_s29, %s3004_s15 }
  0x80   : > { %p2303_p9 = pnand %p2301_p5, %p2968_p8  ;;  %p2308_p6 = por %p2307_p3, %p2306_p2 }
  0x82   : > { %p2304_p12 = pneg %p2303_p9  ;;  %p2310_p0 = por %p2309_p10, %p2308_p6 }
  0x84   : > { %p2311_p11 = pnand %p2310_p0, %p2304_p12 }
  0x86   : > { %2314 = shalt.err (!%p2311_p11)
}
  0x87   : > { %s2315_s20 = scalar_lea.vmem %s608_s3, 16  ;;  %s2684_s1 = smov [#allocation11]  }
  0x88   : > { %p2316_p13 = scmp.ne.s32.totalorder %s608_s3, %s2315_s20  ;;  %s2320_s19 = sshll.u32 %s2684_s1, 4  ;;  %s2321_s19 = int_to_ptr.vmem [resolvable:$false] %s2320_s19 }
  0x89   : > { %s2322_s13 = scalar_lea.vmem %s2321_s19, 32  ;;  %p2323_p5 = scmp.lt.s32.totalorder %s608_s3, %s2321_s19 }
  0x8a   : > { %p2318_p1 = pnand %p2316_p13, %p2968_p8  ;;  %p2324_p9 = scmp.lt.s32.totalorder %s2322_s13, %s2315_s20 }
  0x8c   : > { %p2319_p4 = pneg %p2318_p1  ;;  %p2325_p7 = por %p2324_p9, %p2323_p5 }
  0x8e   : > { %p2326_p2 = pnand %p2325_p7, %p2319_p4 }
  0x90   : > { %2329 = shalt.err (!%p2326_p2)
}
  0x91   : > { %p3528_p3 = scmp.ne.s32.totalorder %s3513_s23, 0  ;;  %s3031_s27 = scalar_lea.hbm %s3437_s10, %s2931_s24 }
  0x92   : > { %s642_s0 = scalar_lea.vmem [#allocation14], %s2928_s17  ;;  %s2685_s20 = smov [#allocation19]  }
  0x93   : > { %2092 = dma.hbm_to_vmem [thread:$0]  (!%p3528_p3), %s3004_s15, 16, %s608_s3, %s3475_s25  }
  0x94   : > { %s649_s30 = sshll.u32 %s642_s0, 4  ;;  %s3036_s1 = sshll.u32 %s2685_s20, 4  ;;  %s3034_s30 = int_to_ptr.vmem [resolvable:$true] %s649_s30  ;;  %s506_s1 = int_to_ptr.vmem [resolvable:$true] %s3036_s1 }
  0x95   : > { %s3477_s19 = scalar_lea.sflag [#allocation15], %s2934_s5  ;;  %s2330_s13 = scalar_lea.hbm %s3031_s27, 16 }
  0x96   : > { %p2331_p7 = scmp.ne.s32.totalorder %s3031_s27, %s2330_s13  ;;  %s2335_s29 = scalar_lea.hbm %s3437_s10, 32 }
  0x97   : > { %p2336_p10 = scmp.lt.u32.totalorder %s3031_s27, %s3437_s10  ;;  %p2337_p0 = scmp.lt.u32.totalorder %s2335_s29, %s2330_s13 }
  0x98   : > { %p2333_p12 = pnand %p2331_p7, %p2968_p8  ;;  %p2339_p13 = scmp.lt.u32.totalorder %s2330_s13, %s3031_s27 }
  0x99   : > { %p2338_p11 = por %p2337_p0, %p2336_p10 }
  0x9a   : > { %p2334_p6 = pneg %p2333_p12 }
  0x9b   : > { %p2340_p1 = por %p2339_p13, %p2338_p11 }
  0x9d   : > { %p2341_p4 = pnand %p2340_p1, %p2334_p6 }
  0x9f   : > { %2344 = shalt.err (!%p2341_p4)
}
  0xa0   : > { %s2345_s0 = scalar_lea.vmem %s3034_s30, 16  ;;  %s2686_s20 = smov [#allocation14]  }
  0xa1   : > { %p2346_p5 = scmp.ne.s32.totalorder %s3034_s30, %s2345_s0  ;;  %s2350_s3 = sshll.u32 %s2686_s20, 4  ;;  %s2351_s3 = int_to_ptr.vmem [resolvable:$false] %s2350_s3 }
  0xa2   : > { %s2352_s25 = scalar_lea.vmem %s2351_s3, 32  ;;  %p2353_p7 = scmp.lt.s32.totalorder %s3034_s30, %s2351_s3 }
  0xa3   : > { %p2348_p9 = pnand %p2346_p5, %p2968_p8  ;;  %p2354_p12 = scmp.lt.s32.totalorder %s2352_s25, %s2345_s0 }
  0xa5   : > { %p2349_p2 = pneg %p2348_p9  ;;  %p2355_p10 = por %p2354_p12, %p2353_p7 }
  0xa7   : > { %p2356_p0 = pnand %p2355_p10, %p2349_p2 }
  0xa9   : > { %2359 = shalt.err (!%p2356_p0)
}
  0xaa   : > { %2098 = dma.hbm_to_vmem [thread:$0]  (!%p3528_p3), %s3031_s27, 16, %s3034_s30, %s3477_s19  }
  0xab   : > { %s2360_s29 = scalar_lea.hbm %s3441_s14, 16  ;;  %p3529_p11 = scmp.ne.s32.totalorder %s3515_s4, 0 }
  0xac   : > { %p2361_p6 = scmp.ne.s32.totalorder %s3441_s14, %s2360_s29  ;;  %p2367_p4 = scmp.lt.u32.totalorder %s2360_s29, %s3441_s14 }
  0xae   : > { %p2363_p13 = pnand %p2361_p6, %p3529_p11 }
  0xb0   : > { %p2364_p1 = pneg %p2363_p13 }
  0xb2   : > { %p2369_p5 = pnand %p2367_p4, %p2364_p1 }
  0xb4   : > { %2372 = shalt.err (!%p2369_p5)
}
  0xb5   : > { %s2373_s25 = scalar_lea.vmem %s506_s1, 16  ;;  %s2380_s27 = scalar_lea.vmem %s506_s1, 32 }
  0xb6   : > { %p2374_p9 = scmp.ne.s32.totalorder %s506_s1, %s2373_s25  ;;  %p2381_p12 = scmp.lt.s32.totalorder %s506_s1, %s506_s1 }
  0xb7   : > { %p2382_p10 = scmp.lt.s32.totalorder %s2380_s27, %s2373_s25 }
  0xb8   : > { %p2376_p2 = pnand %p2374_p9, %p3529_p11 }
  0xb9   : > { %p2383_p0 = por %p2382_p10, %p2381_p12 }
  0xba   : > { %p2377_p7 = pneg %p2376_p2 }
  0xbc   : > { %p2384_p3 = pnand %p2383_p0, %p2377_p7 }
  0xbe   : > { %2387 = shalt.err (!%p2384_p3)
}
  0xbf   : > { %p3530_p6 = scmp.ne.s32.totalorder %s3512_s21, 0  ;;  %s2687_s15 = smov [#allocation20]  }
  0xc0   : > { %s519_s29 = sshll.u32 %s2687_s15, 4  ;;  %s2388_s0 = scalar_lea.hbm %s3443_s16, 16  ;;  %s520_s29 = int_to_ptr.vmem [resolvable:$true] %s519_s29 }
  0xc1   : > { %2076 = dma.hbm_to_vmem [thread:$0]  (!%p3530_p6), %s3441_s14, 16, %s506_s1, [#allocation18]  }
  0xc2   : > { %p2389_p13 = scmp.ne.s32.totalorder %s3443_s16, %s2388_s0  ;;  %p2395_p4 = scmp.lt.u32.totalorder %s2388_s0, %s3443_s16 }
  0xc4   : > { %p2391_p3 = pnand %p2389_p13, %p3529_p11 }
  0xc6   : > { %p2392_p1 = pneg %p2391_p3 }
  0xc8   : > { %p2397_p5 = pnand %p2395_p4, %p2392_p1 }
  0xca   : > { %2400 = shalt.err (!%p2397_p5)
}
  0xcb   : > { %s2401_s1 = scalar_lea.vmem %s520_s29, 16  ;;  %s2408_s30 = scalar_lea.vmem %s520_s29, 32 }
  0xcc   : > { %p2402_p9 = scmp.ne.s32.totalorder %s520_s29, %s2401_s1  ;;  %p2409_p12 = scmp.lt.s32.totalorder %s520_s29, %s520_s29 }
  0xcd   : > { %p2410_p10 = scmp.lt.s32.totalorder %s2408_s30, %s2401_s1 }
  0xce   : > { %p2404_p2 = pnand %p2402_p9, %p3529_p11 }
  0xcf   : > { %p2411_p0 = por %p2410_p10, %p2409_p12 }
  0xd0   : > { %p2405_p7 = pneg %p2404_p2 }
  0xd2   : > { %p2412_p8 = pnand %p2411_p0, %p2405_p7 }
  0xd4   : > { %2415 = shalt.err (!%p2412_p8)
}
  0xd5   : > { %2079 = dma.hbm_to_vmem [thread:$0]  (!%p3530_p6), %s3443_s16, 16, %s520_s29, [#allocation21]  }
  0xd6   : > { %s3531_s2 = sld [smem:[#allocation49_spill]]  ;;  %s533_s20 = scalar_lea.vmem [#allocation5], %s2928_s17 }
  0xd7   : > { %s540_s0 = sshll.u32 %s533_s20, 4  ;;  %s531_s21 = scalar_lea.sflag [#allocation6], %s2928_s17  ;;  %s541_s0 = int_to_ptr.vmem [resolvable:$true] %s540_s0 }
  0xd8   : > { %p3532_p11 = scmp.ne.s32.totalorder %s3523_s18, 0 }
  0xdc   : > { %s3103_s9 = scalar_lea.hbm %s3531_s2, %s2931_s24  ;;  %s2421_s27 = scalar_lea.hbm %s3531_s2, 32 }
  0xdd   : > { %s2416_s3 = scalar_lea.hbm %s3103_s9, 16  ;;  %p2422_p6 = scmp.lt.u32.totalorder %s3103_s9, %s3531_s2 }
  0xde   : > { %p2417_p8 = scmp.ne.s32.totalorder %s3103_s9, %s2416_s3  ;;  %p2423_p1 = scmp.lt.u32.totalorder %s2421_s27, %s2416_s3 }
  0xdf   : > { %p2425_p5 = scmp.lt.u32.totalorder %s2416_s3, %s3103_s9 }
  0xe0   : > { %p2419_p13 = pnand %p2417_p8, %p3532_p11  ;;  %p2424_p4 = por %p2423_p1, %p2422_p6 }
  0xe2   : > { %p2420_p3 = pneg %p2419_p13  ;;  %p2426_p9 = por %p2425_p5, %p2424_p4 }
  0xe4   : > { %p2427_p2 = pnand %p2426_p9, %p2420_p3 }
  0xe6   : > { %2430 = shalt.err (!%p2427_p2)
}
  0xe7   : > { %s2431_s19 = scalar_lea.vmem %s541_s0, 16  ;;  %s2688_s13 = smov [#allocation5]  }
  0xe8   : > { %p2432_p7 = scmp.ne.s32.totalorder %s541_s0, %s2431_s19  ;;  %s2436_s15 = sshll.u32 %s2688_s13, 4  ;;  %s2437_s15 = int_to_ptr.vmem [resolvable:$false] %s2436_s15 }
  0xe9   : > { %s2438_s4 = scalar_lea.vmem %s2437_s15, 32  ;;  %p2439_p0 = scmp.lt.s32.totalorder %s541_s0, %s2437_s15 }
  0xea   : > { %p2434_p12 = pnand %p2432_p7, %p3532_p11  ;;  %p2440_p8 = scmp.lt.s32.totalorder %s2438_s4, %s2431_s19 }
  0xec   : > { %p2435_p10 = pneg %p2434_p12  ;;  %p2441_p13 = por %p2440_p8, %p2439_p0 }
  0xee   : > { %p2442_p1 = pnand %p2441_p13, %p2435_p10 }
  0xf0   : > { %2445 = shalt.err (!%p2442_p1)
}
  0xf1   : > { %p3533_p6 = scmp.ne.s32.totalorder %s3513_s23, 0  ;;  %s3534_s6 = sld [smem:[#allocation53_spill]] }
  0xf2   : > { %s583_s29 = scalar_lea.vmem [#allocation10], %s2928_s17 }
  0xf3   : > { %2083 = dma.hbm_to_vmem [thread:$0]  (!%p3533_p6), %s3103_s9, 16, %s541_s0, %s531_s21  }
  0xf4   : > { %s590_s27 = sshll.u32 %s583_s29, 4  ;;  %s591_s27 = int_to_ptr.vmem [resolvable:$true] %s590_s27 }
  0xf7   : > { %s3128_s25 = scalar_lea.hbm %s3534_s6, %s2931_s24  ;;  %s2451_s9 = scalar_lea.hbm %s3534_s6, 32 }
  0xf8   : > { %s2446_s1 = scalar_lea.hbm %s3128_s25, 16  ;;  %p2452_p9 = scmp.lt.u32.totalorder %s3128_s25, %s3534_s6 }
  0xf9   : > { %p2447_p3 = scmp.ne.s32.totalorder %s3128_s25, %s2446_s1  ;;  %p2453_p2 = scmp.lt.u32.totalorder %s2451_s9, %s2446_s1 }
  0xfa   : > { %p2455_p12 = scmp.lt.u32.totalorder %s2446_s1, %s3128_s25 }
  0xfb   : > { %p2449_p4 = pnand %p2447_p3, %p3532_p11  ;;  %p2454_p7 = por %p2453_p2, %p2452_p9 }
  0xfd   : > { %p2450_p5 = pneg %p2449_p4  ;;  %p2456_p10 = por %p2455_p12, %p2454_p7 }
  0xff   : > { %p2457_p0 = pnand %p2456_p10, %p2450_p5 }
 0x101   : > { %2460 = shalt.err (!%p2457_p0)
}
 0x102   : > { %s2461_s13 = scalar_lea.vmem %s591_s27, 16  ;;  %s2689_s15 = smov [#allocation10]  }
 0x103   : > { %p2462_p8 = scmp.ne.s32.totalorder %s591_s27, %s2461_s13  ;;  %s2466_s4 = sshll.u32 %s2689_s15, 4  ;;  %s2467_s4 = int_to_ptr.vmem [resolvable:$false] %s2466_s4 }
 0x104   : > { %s2468_s20 = scalar_lea.vmem %s2467_s4, 32  ;;  %p2469_p3 = scmp.lt.s32.totalorder %s591_s27, %s2467_s4 }
 0x105   : > { %p2464_p13 = pnand %p2462_p8, %p3532_p11  ;;  %p2470_p4 = scmp.lt.s32.totalorder %s2468_s20, %s2461_s13 }
 0x107   : > { %p2465_p1 = pneg %p2464_p13  ;;  %p2471_p6 = por %p2470_p4, %p2469_p3 }
 0x109   : > { %p2472_p2 = pnand %p2471_p6, %p2465_p1 }
 0x10b   : > { %2475 = shalt.err (!%p2472_p2)
}
 0x10c   : > { %p3535_p9 = scmp.ne.s32.totalorder %s3513_s23, 0  ;;  %s3536_s3 = scalar_lea.sflag [#allocation9], %s2934_s5 }
 0x10d   : > { %s3537_s8 = sld [smem:[#allocation55_spill]]  ;;  %s617_s19 = scalar_lea.vmem [#allocation13], %s2928_s17 }
 0x10e   : > { %2089 = dma.hbm_to_vmem [thread:$0]  (!%p3535_p9), %s3128_s25, 16, %s591_s27, %s3536_s3  }
 0x10f   : > { %s624_s9 = sshll.u32 %s617_s19, 4  ;;  %s625_s9 = int_to_ptr.vmem [resolvable:$true] %s624_s9 }
 0x113   : > { %s3154_s30 = scalar_lea.hbm %s3537_s8, %s2931_s24  ;;  %s2481_s25 = scalar_lea.hbm %s3537_s8, 32 }
 0x114   : > { %s2476_s0 = scalar_lea.hbm %s3154_s30, 16  ;;  %p2482_p12 = scmp.lt.u32.totalorder %s3154_s30, %s3537_s8 }
 0x115   : > { %p2477_p6 = scmp.ne.s32.totalorder %s3154_s30, %s2476_s0  ;;  %p2483_p10 = scmp.lt.u32.totalorder %s2481_s25, %s2476_s0 }
 0x116   : > { %p2485_p8 = scmp.lt.u32.totalorder %s2476_s0, %s3154_s30 }
 0x117   : > { %p2479_p5 = pnand %p2477_p6, %p3532_p11  ;;  %p2484_p0 = por %p2483_p10, %p2482_p12 }
 0x119   : > { %p2480_p7 = pneg %p2479_p5  ;;  %p2486_p13 = por %p2485_p8, %p2484_p0 }
 0x11b   : > { %p2487_p1 = pnand %p2486_p13, %p2480_p7 }
 0x11d   : > { %2490 = shalt.err (!%p2487_p1)
}
 0x11e   : > { %s2491_s4 = scalar_lea.vmem %s625_s9, 16  ;;  %s2690_s20 = smov [#allocation13]  }
 0x11f   : > { %p2492_p3 = scmp.ne.s32.totalorder %s625_s9, %s2491_s4  ;;  %s2496_s3 = sshll.u32 %s2690_s20, 4  ;;  %s2497_s3 = int_to_ptr.vmem [resolvable:$false] %s2496_s3 }
 0x120   : > { %s2498_s29 = scalar_lea.vmem %s2497_s3, 32  ;;  %p2499_p6 = scmp.lt.s32.totalorder %s625_s9, %s2497_s3 }
 0x121   : > { %p2494_p4 = pnand %p2492_p3, %p3532_p11  ;;  %p2500_p5 = scmp.lt.s32.totalorder %s2498_s29, %s2491_s4 }
 0x123   : > { %p2495_p2 = pneg %p2494_p4  ;;  %p2501_p9 = por %p2500_p5, %p2499_p6 }
 0x125   : > { %p2502_p10 = pnand %p2501_p9, %p2495_p2 }
 0x127   : > { %2505 = shalt.err (!%p2502_p10)
}
 0x128   : > { %p3538_p12 = scmp.ne.s32.totalorder %s3513_s23, 0  ;;  %s3539_s1 = scalar_lea.sflag [#allocation12], %s2934_s5 }
 0x129   : > { %s3180_s21 = scalar_lea.hbm %s3439_s12, %s2931_s24  ;;  %s667_s13 = scalar_lea.vmem [#allocation16], %s2928_s17 }
 0x12a   : > { %2095 = dma.hbm_to_vmem [thread:$0]  (!%p3538_p12), %s3154_s30, 16, %s625_s9, %s3539_s1  }
 0x12b   : > { %s674_s25 = sshll.u32 %s667_s13, 4  ;;  %s2506_s27 = scalar_lea.hbm %s3180_s21, 16  ;;  %s675_s25 = int_to_ptr.vmem [resolvable:$true] %s674_s25 }
 0x12c   : > { %p2507_p9 = scmp.ne.s32.totalorder %s3180_s21, %s2506_s27  ;;  %s2511_s30 = scalar_lea.hbm %s3439_s12, 32 }
 0x12d   : > { %p2512_p8 = scmp.lt.u32.totalorder %s3180_s21, %s3439_s12  ;;  %p2513_p13 = scmp.lt.u32.totalorder %s2511_s30, %s2506_s27 }
 0x12e   : > { %p2509_p7 = pnand %p2507_p9, %p3532_p11  ;;  %p2515_p3 = scmp.lt.u32.totalorder %s2506_s27, %s3180_s21 }
 0x12f   : > { %p2514_p1 = por %p2513_p13, %p2512_p8 }
 0x130   : > { %p2510_p0 = pneg %p2509_p7 }
 0x131   : > { %p2516_p4 = por %p2515_p3, %p2514_p1 }
 0x133   : > { %p2517_p2 = pnand %p2516_p4, %p2510_p0 }
 0x135   : > { %2520 = shalt.err (!%p2517_p2)
}
 0x136   : > { %s2521_s17 = scalar_lea.vmem %s675_s25, 16  ;;  %s2691_s24 = smov [#allocation16]  }
 0x137   : > { %p2522_p6 = scmp.ne.s32.totalorder %s675_s25, %s2521_s17  ;;  %s2526_s3 = sshll.u32 %s2691_s24, 4  ;;  %s2527_s3 = int_to_ptr.vmem [resolvable:$false] %s2526_s3 }
 0x138   : > { %s2528_s29 = scalar_lea.vmem %s2527_s3, 32  ;;  %p2529_p9 = scmp.lt.s32.totalorder %s675_s25, %s2527_s3 }
 0x139   : > { %p2524_p5 = pnand %p2522_p6, %p3532_p11  ;;  %p2530_p7 = scmp.lt.s32.totalorder %s2528_s29, %s2521_s17 }
 0x13b   : > { %p2525_p10 = pneg %p2524_p5  ;;  %p2531_p12 = por %p2530_p7, %p2529_p9 }
 0x13d   : > { %p2532_p8 = pnand %p2531_p12, %p2525_p10 }
 0x13f   : > { %2535 = shalt.err (!%p2532_p8)
}
 0x140   : > { %p3540_p13 = scmp.ne.s32.totalorder %s3513_s23, 0  ;;  %s3541_s1 = scalar_lea.sflag [#allocation15], %s2934_s5 }
 0x141   : > { %p3542_p0 = scmp.ne.s32.totalorder %s3511_s22, 0 }
 0x142   : > { %2101 = dma.hbm_to_vmem [thread:$0]  (!%p3540_p13), %s3180_s21, 16, %s675_s25, %s3541_s1  }
 0x143   : > { %683 = sbr.rel (%p3542_p0) target bundleno = 3448 (0xd78), region = 84  ;;  %s3543_s18 = sld [smem:[#allocation41_spill]] (!%p3542_p0) }
 0x144   : > { %s3205_s19 = sand.u32 (!%p3542_p0), 1, %s2656_s28  }
 0x145   : > { %s686_s0 = scalar_lea.sflag (!%p3542_p0), [#allocation6], %s3205_s19 }
 0x149   : > { %p3544_p11 = scmp.ne.s32.totalorder (!%p3542_p0), %s3543_s18, 0 }
 0x14b   : > { %2609 = dma.done.wait (%p3544_p11), %s686_s0, 16  }
 0x14c   : > { %2611 = vsyncadd (%p3544_p11), %s686_s0, 4294967280  ;;  %s3545_s23 = sld [smem:[#allocation40_spill]] }
 0x152   : > { %s693_s5 = sand.u32 1, %s3545_s23  }
 0x153   : > { %s694_s21 = scalar_lea.sflag [#allocation9], %s693_s5 }
 0x154   : > { %2613 = dma.done.wait (%p3544_p11), %s694_s21, 32  }
 0x155   : > { %2615 = vsyncadd (%p3544_p11), %s694_s21, 4294967264  ;;  %s710_s27 = scalar_lea.sflag [#allocation12], %s693_s5 }
 0x156   : > { %2617 = dma.done.wait (%p3544_p11), %s710_s27, 32  }
 0x157   : > { %2619 = vsyncadd (%p3544_p11), %s710_s27, 4294967264  ;;  %s726_s30 = scalar_lea.sflag [#allocation15], %s693_s5 }
 0x158   : > { %2621 = dma.done.wait (%p3544_p11), %s726_s30, 32  }
 0x159   : > { %2623 = vsyncadd (%p3544_p11), %s726_s30, 4294967264  ;;  %p3546_p12 = scmp.eq.s32.totalorder %s3545_s23, 0 }
 0x15b   : > { %2625 = dma.done.wait (%p3546_p12), [#allocation18], 32   ;;  %p3547_p1 = pmov %p3546_p12 }
 0x15d   : > { %2627 = vsyncadd (%p3547_p1), [#allocation18], 4294967264  ;;  %p3548_p3 = pmov %p3547_p1 }
 0x15e   : > { %p3549_p4 = pmov %p3547_p1 }
 0x15f   : > { %2629 = dma.done.wait (%p3548_p3), [#allocation21], 16  }
 0x160   : > { %2631 = vsyncadd (%p3549_p4), [#allocation21], 4294967280  ;;  %s3550_s17 = sld [smem:[#allocation33_spill]]  ;;  %s3552_s27 = sld [smem:[#allocation51_spill]] }
 0x161   : > { %s3551_s24 = sld [smem:[#allocation35_spill]]  ;;  %s3553_s9 = sld [smem:[#allocation52_spill]] }
 0x162   : > { %s3554_s22 = sld [smem:[#allocation56_spill]]  ;;  %s3555_s6 = sld [smem:[#allocation57_spill]] }
 0x166   : > { %s3480_s3 = sand.u32 1, %s3550_s17  }
 0x167   : > { %p840_p2 = scmp.lt.s32.totalorder %s3551_s24, 1  ;;  %s3244_s29 = sshll.u32 %s3480_s3, 3 }
 0x168   : > { %s839_s8 = scalar_lea.vmem [#allocation22], %s3244_s29  ;;  %p1910_p6 = scmp.ne.s32.totalorder %s3551_s24, 0 }
 0x169   : > { %s841_s1 = scalar_select %p840_p2, %s3551_s24, 1 }
 0x16a   : > { %864 = sbr.rel (%p1910_p6) target bundleno = 378 (0x17a), region = 128  ;;  %s3556_s5 = sld [smem:[#allocation36_spill]] (!%p1910_p6) }
 0x16b   : > { %s1948_s18 = sshll.u32 %s841_s1, 4  ;;  %s1949_s0 = sshll.u32 %s841_s1, 3 }
 0x16c   : > { %s3250_s30 = scalar_lea.vmem %s3552_s27, %s1948_s18  ;;  %s3255_s4 = scalar_lea.vmem %s3553_s9, %s1949_s0 }
 0x16d   : > { %s3260_s17 = scalar_lea.vmem %s3554_s22, %s1948_s18  ;;  %s1951_s3 = sshll.u32 %s841_s1, 5 }
 0x16e   : > { %s3265_s7 = scalar_lea.vmem %s3555_s6, %s1951_s3  ;;  %s3557_s0 = sld [smem:[#allocation47_spill]] (!%p1910_p6) }
 0x170   : > { %s1911_s21 = sshll.u32 (!%p1910_p6), %s3556_s5, 3 }
 0x174   : > { %s866_s27 = scalar_lea.vmem %s3557_s0, %s1911_s21 }
 0x175   : > { %v899_v0 = vld [vmem:[%s866_s27] sm:$0xff] }
 0x176   : > { %900 = vst [vmem:[#allocation2] sm:$0xff] %v899_v0 }
 0x177   : > { %908 = vsyncadd [#allocation4], 128 }
 0x178   : > { %2632 = dma.done.wait [#allocation4], 128 }
 0x179   : > { %2633 = vsyncadd [#allocation4], 4294967168 }
 0x17a PF: > { %vm915_vm0 = vcmask 261120   ;;  %v2215_v8 = vld [vmem:[%s3250_s30] sm:$0xff]   ;;  %v2692_v9 = vmov 0.0   ;;  %vm2693_vm1 = vmmov 0   ;;  %v2216_v10 = vld [vmem:[%s3250_s30 + $0x8] sm:$0xff]   ;;  %s3558_s2 = scalar_lea.vmem [#allocation5], %s3205_s19 }
 0x17b   : > { %1976 = vmatprep.subr.bf16.mxu0 %v2692_v9  ;;  %1980 = vmatprep.mubr.msk.bf16.mxu0 %vm2693_vm1, %v2692_v9  ;;  %v1912_v15 = vld [vmem:[%s3558_s2] ss:$0 sm:$0xff]  ;;  %s3559_s6 = scalar_lea.vmem [#allocation8], %s3205_s19  ;;  %s2694_s13 = smov 120   ;;  %vm1009_vm2 = vcmask 64512   ;;  %vm1074_vm3 = vcmask 1043456  }
 0x17c   : > { %1977 = vmatpush3.bf16.msra.mxu0 %v2215_v8  ;;  %1984 = vmatprep.subr.bf16.mxu1 %v2692_v9  ;;  %v1913_v17 = vld [vmem:[%s3559_s6] ss:$0 sm:$0xff]  ;;  %s2695_s22 = smov 112   ;;  %s2696_s25 = smov 104   ;;  %vm1234_vm4 = vcmask 130112   ;;  %vm1246_vm5 = vcmask 130048  }
 0x17d   : > { %v3273_v1 = vld [vmem:[#allocation2] sm:$0xff]  ;;  %1978 = vmatprep.subr.bf16.mxu0 %v2692_v9  ;;  %1986 = vmatprep.mubr.msk.bf16.mxu1 %vm2693_vm1, %v2692_v9  ;;  %s2697_s15 = smov 88   ;;  %s2698_s24 = smov 96   ;;  %vm1440_vm6 = vcmask 523264  }
 0x17e   : > { %v916_v2 = vsel %vm915_vm0, %v3273_v1, 0.0  ;;  %s3560_s18 = sld [smem:[#allocation48_spill]]  ;;  %s2699_s30 = smov 8  }
 0x17f   : > { %917 = vadd.xlane.f32.xlu0 %v916_v2  ;;  %s3562_s23 = scalar_lea.vmem [#allocation11], %s3205_s19  ;;  %s3563_s5 = scalar_lea.vmem [#allocation13], %s3205_s19 }
 0x180   : > { %1979 = vmatpush3.bf16.msra.mxu0 %v2216_v10  ;;  %s3565_s21 = scalar_lea.vmem [#allocation16], %s3205_s19 }
 0x181   : > { %1990 = vmatprep.subr.bf16.mxu0 %v2692_v9 }
 0x184   : > { %v1004_v54 = vld [vmem:[%s3560_s18] sm:$0xff] }
 0x20c   : > { %v918_v3 = vpop.xlane.xlu0 %917 }
 0x20d   : > { %v920_v4 = vmul.f32 0.03125, %v918_v3  ;;  %v2217_v3 = vld [vmem:[%s3255_s4] sm:$0xff]   ;;  %s3561_s4 = scalar_lea.vmem [#allocation10], %s3205_s19 }
 0x20f   : > { %v921_v5 = vsub.f32 %v3273_v1, %v920_v4 }
 0x211   : > { %v922_v6 = vmul.f32 %v921_v5, %v921_v5 }
 0x213   : > { %v923_v7 = vsel %vm915_vm0, %v922_v6, 0.0 }
 0x214   : > { %924 = vadd.xlane.f32.xlu0 %v923_v7 }
 0x2a1   : > { %v925_v11 = vpop.xlane.xlu0 %924 }
 0x2a2   : > { %v926_v12 = vmul.f32 0.03125, %v925_v11 }
 0x2a4   : > { %v927_v13 = vadd.f32 1e-05, %v926_v12 }
 0x2a6   : > { %2224 = vrsqrt.f32 %v927_v13 }
 0x2b0   : > { %v2225_v14 = vpop.eup %2224 }
 0x2b1   : > { %v929_v16 = vmul.f32 %v2225_v14, %v921_v5 }
 0x2b3   : > { %v936_v18 = vmul.f32 %v1912_v15, %v929_v16 }
 0x2b5   : > { %v943_v19 = vadd.f32 %v1913_v17, %v936_v18  ;;  %v1923_v17 = vld [vmem:[%s3561_s4] ss:$0 sm:$0xff] }
 0x2b7   : > { %v944_v20 = vpack.c.bf16 %v943_v19, %v943_v19 }
 0x2b9   : > { %1981 = vmatmul.mubr.msk.bf16.vlgmr.msra.gmra.mrb[0].mxu0 %vm915_vm0, %v944_v20 }
 0x2ba   : > { %1992 = vmatprep.mubr.msk.bf16.mxu0 %vm2693_vm1, %v2692_v9 }
 0x38c   : > { %v998_v21 = vpop.f32.mrb[0].mxu0 }
 0x38d   : > { %v1005_v22 = vpack.c.bf16 %v998_v21, %v998_v21  ;;  %v1982_v23 = vpop.f32.mrb[1].mxu0 }
 0x38e   : > { %v1001_v24 = vpop.f32.mrb[2].mxu0 }
 0x38f   : > { %1119 = vrot.lane.b32.xlu0 %v1005_v22, %s2694_s13  ;;  %1007 = vrot.lane.b32.xlu1 %v1005_v22, %s2695_s22  ;;  %v1983_v25 = vpop.f32.mrb[3].mxu0 }
 0x393   : > { %1121 = vrot.lane.b32.xlu1 %v1005_v22, %s2696_s25 }
 0x401   : > { %v1008_v26 = vpop.permute.xlu1 %1007  ;;  %v1120_v30 = vpop.permute.xlu0 %1119 }
 0x402   : > { %v1014_v27 = vsel %vm1009_vm2, %v1008_v26, 0 }
 0x403   : > { %1985 = vmatpush3.bf16.xpose.msra.mxu1 %v1014_v27 }
 0x404   : > { %1996 = vmatprep.subr.bf16.mxu1 %v2692_v9 }
 0x405   : > { %v1122_v28 = vpop.permute.xlu1 %1121 }
 0x406   : > { %v1127_v29 = vsel %vm1009_vm2, %v1122_v28, 0 }
 0x40a   : > { %1987 = vmatmul.mubr.msk.bf16.vlgmr.msra.gmra.mrb[0].mxu1 %vm1009_vm2, %v1005_v22 }
 0x40b   : > { %1997 = vmatpush3.bf16.xpose.msra.mxu1 %v1127_v29  ;;  %1998 = vmatprep.mubr.msk.bf16.mxu1 %vm2693_vm1, %v2692_v9  ;;  %v2218_v29 = vld [vmem:[%s3260_s17] sm:$0xff]  }
 0x40c   : > { %2008 = vmatprep.subr.bf16.mxu1 %v2692_v9 }
 0x412   : > { %1999 = vmatmul.mubr.msk.bf16.vlgmr.msra.gmra.mrb[4].mxu1 %vm1009_vm2, %v1120_v30 }
 0x413   : > { %2010 = vmatprep.mubr.msk.bf16.mxu1 %vm2693_vm1, %v2692_v9  ;;  %2009 = vmatpush3.bf16.msra.mxu1 %v2217_v3 }
 0x414   : > { %2022 = vmatprep.subr.bf16.mxu1 %v2692_v9 }
 0x4dd   : > { %v1050_v31 = vpop.f32.mrb[0].mxu1 }
 0x4de   : > { %v1988_v32 = vpop.f32.mrb[1].mxu1  ;;  %v1056_v33 = vsel %vm1009_vm2, %v1050_v31, -inf }
 0x4df   : > { %1057 = vmax.xlane.f32.xlu1 %v1056_v33  ;;  %v1053_v34 = vpop.f32.mrb[2].mxu1 }
 0x4e0   : > { %v1989_v35 = vpop.f32.mrb[3].mxu1  ;;  %v1924_v34 = vld [vmem:[%s3562_s23] ss:$0 sm:$0xff] }
 0x4e5   : > { %v1163_v36 = vpop.f32.mrb[4].mxu1 }
 0x4e6   : > { %v2000_v37 = vpop.f32.mrb[5].mxu1  ;;  %v1169_v38 = vsel %vm1009_vm2, %v1163_v36, -inf }
 0x4e7   : > { %1170 = vmax.xlane.f32.xlu0 %v1169_v38  ;;  %v1166_v39 = vpop.f32.mrb[6].mxu1 }
 0x4e8   : > { %v2001_v40 = vpop.f32.mrb[7].mxu1 }
 0x4e9   : > { %v2220_v40 = vld [vmem:[%s3265_s7] sm:$0xff]  }
 0x4fd   : > { %1182 = vrot.lane.b32.xlu0 %v1005_v22, %s2697_s15 }
 0x56c   : > { %v1058_v41 = vpop.xlane.xlu1 %1057 }
 0x56d   : > { %v1059_v42 = vsub.f32 %v1050_v31, %v1058_v41  ;;  %v2221_v41 = vld [vmem:[%s3265_s7 + $0x8] sm:$0xff]  }
 0x56f   : > { %v1060_v43 = vmul.f32 1.442695, %v1059_v42  ;;  %v2222_v42 = vld [vmem:[%s3265_s7 + $0x10] sm:$0xff]  }
 0x571   : > { %2226 = vpow2.f32 %v1060_v43  ;;  %v2223_v43 = vld [vmem:[%s3265_s7 + $0x18] sm:$0xff]   ;;  %s3566_s7 = sld [smem:[#allocation35_spill]] }
 0x574   : > { %v1171_v44 = vpop.xlane.xlu0 %1170 }
 0x575   : > { %v1172_v45 = vsub.f32 %v1163_v36, %v1171_v44  ;;  %v1925_v36 = vld [vmem:[%s3563_s5] ss:$0 sm:$0xff] }
 0x577   : > { %v1173_v46 = vmul.f32 1.442695, %v1172_v45  ;;  %p1936_p5 = scmp.ne.s32.totalorder %s3566_s7, 1 }
 0x578   : > { %v1183_v59 = vpop.permute.xlu0 %1182  ;;  %s3567_s9 = sld [smem:[#allocation59_spill]] (!%p1936_p5)  ;;  %vm2701_vm7 = vmmov (!%p1936_p5), 0  }
 0x579   : > { %2228 = vpow2.f32 %v1173_v46  ;;  %v1188_v61 = vsel %vm1074_vm3, %v1183_v59, 0 }
 0x57b   : > { %v2227_v47 = vpop.eup %2226 }
 0x57c   : > { %v1062_v48 = vsel %vm1009_vm2, %v2227_v47, 0.0 }
 0x57d   : > { %1063 = vadd.xlane.f32.xlu1 %v1062_v48 }
 0x583   : > { %v2229_v49 = vpop.eup %2228 }
 0x584   : > { %v1175_v50 = vsel %vm1009_vm2, %v2229_v49, 0.0 }
 0x585   : > { %1176 = vadd.xlane.f32.xlu1 %v1175_v50 }
 0x596   : > { %1069 = vrot.lane.b32.xlu1 %v1005_v22, %s2698_s24 }
 0x60a   : > { %v1064_v51 = vpop.xlane.xlu1 %1063 }
 0x60b   : > { %2230 = vrcp.f32 %v1064_v51 }
 0x612   : > { %v1177_v52 = vpop.xlane.xlu1 %1176 }
 0x613   : > { %2232 = vrcp.f32 %v1177_v52 }
 0x615   : > { %v2231_v53 = vpop.eup %2230 }
 0x616   : > { %v1066_v55 = vmul.f32 %v2231_v53, %v2227_v47  ;;  %v1070_v56 = vpop.permute.xlu1 %1069 }
 0x617   : > { %v1076_v57 = vsel %vm1074_vm3, %v1070_v56, 0 }
 0x618   : > { %1991 = vmatpush3.bf16.msra.mxu0 %v1076_v57  ;;  %v1067_v58 = vadd.f32 %v1066_v55, %v1004_v54 }
 0x619   : > { %2002 = vmatprep.subr.bf16.mxu0 %v2692_v9 }
 0x61a   : > { %v1068_v60 = vpack.c.bf16 %v1067_v58, %v1067_v58 }
 0x61c   : > { %1993 = vmatmul.mubr.msk.bf16.vlgmr.msra.gmra.mrb[4].mxu0 %vm1009_vm2, %v1068_v60 }
 0x61d   : > { %v2233_v62 = vpop.eup %2232  ;;  %2003 = vmatpush3.bf16.msra.mxu0 %v1188_v61  ;;  %2004 = vmatprep.mubr.msk.bf16.mxu0 %vm2693_vm1, %v2692_v9 }
 0x61e   : > { %v1179_v63 = vmul.f32 %v2233_v62, %v2229_v49  ;;  %2014 = vmatprep.subr.bf16.mxu0 %v2692_v9 }
 0x620   : > { %v1180_v0 = vadd.f32 %v1179_v63, %v1004_v54 }
 0x622   : > { %v1181_v2 = vpack.c.bf16 %v1180_v0, %v1180_v0 }
 0x624   : > { %2005 = vmatmul.mubr.msk.bf16.vlgmr.msra.gmra.mrb[8].mxu0 %vm1009_vm2, %v1181_v2 }
 0x625   : > { %2018 = vmatprep.mubr.msk.bf16.mxu0 %vm2693_vm1, %v2692_v9  ;;  %2015 = vmatpush3.bf16.msra.mxu0 %v2218_v29 }
 0x626   : > { %2016 = vmatprep.subr.bf16.mxu0 %v2692_v9 }
 0x6ef   : > { %v1112_v4 = vpop.f32.mrb[4].mxu0 }
 0x6f0   : > { %1118 = vst.msk [vmem:[#allocation3] sm:$0xff] %vm1009_vm2, %v1112_v4  ;;  %v1994_v5 = vpop.f32.mrb[5].mxu0 }
 0x6f1   : > { %v1115_v6 = vpop.f32.mrb[6].mxu0  ;;  %v2238_v5 = vld [vmem:[%s3567_s9] sm:$0xff] (!%p1936_p5)  }
 0x6f2   : > { %v1995_v7 = vpop.f32.mrb[7].mxu0  ;;  %v2700_v6 = vmov (!%p1936_p5), 0.0  }
 0x6f3   : > { %v2239_v7 = vld [vmem:[%s3567_s9 + $0x8] sm:$0xff] (!%p1936_p5)  }
 0x6f7   : > { %v1224_v8 = vpop.f32.mrb[8].mxu0 }
 0x6f8   : > { %1231 = vrot.lane.b32.xlu1 %v1224_v8, %s2699_s30  ;;  %v2006_v10 = vpop.f32.mrb[9].mxu0 }
 0x6f9   : > { %v1227_v11 = vpop.f32.mrb[10].mxu0 }
 0x6fa   : > { %v2007_v12 = vpop.f32.mrb[11].mxu0 }
 0x76a   : > { %v1232_v13 = vpop.permute.xlu1 %1231 }
 0x76b   : > { %1235 = vst.msk [vmem:[#allocation3] sm:$0xff] %vm1234_vm4, %v1232_v13  ;;  %v1937_v13 = vld [vmem:[#allocation17] ss:$0 sm:$0xff] (!%p1936_p5) }
 0x772   : > { %v1236_v14 = vld [vmem:[#allocation3] sm:$0xff] }
 0x773   : > { %v1237_v15 = vpack.c.bf16 %v1236_v14, %v1236_v14 }
 0x775   : > { %2011 = vmatmul.mubr.msk.bf16.vlgmr.msra.gmra.mrb[8].mxu1 %vm1246_vm5, %v1237_v15  ;;  %v1938_v15 = vld [vmem:[#allocation19] ss:$0 sm:$0xff] (!%p1936_p5) }
 0x776   : > { %2030 = vmatprep.mubr.msk.bf16.mxu1 %vm2693_vm1, %v2692_v9  ;;  %2023 = vmatpush3.bf16.msra.mxu1 %v2220_v40 }
 0x777   : > { %2024 = vmatprep.subr.bf16.mxu1 %v2692_v9 }
 0x77a   : > { %2025 = vmatpush3.bf16.msra.mxu1 %v2221_v41 }
 0x77b   : > { %2026 = vmatprep.subr.bf16.mxu1 %v2692_v9 }
 0x77e   : > { %2027 = vmatpush3.bf16.msra.mxu1 %v2222_v42 }
 0x77f   : > { %2028 = vmatprep.subr.bf16.mxu1 %v2692_v9  ;;  %v1930_v9 = vld [vmem:[%s3565_s21] ss:$0 sm:$0xff] }
 0x782   : > { %2029 = vmatpush3.bf16.msra.mxu1 %v2223_v43 }
 0x848   : > { %v1284_v16 = vpop.f32.mrb[8].mxu1 }
 0x849   : > { %v1290_v18 = vadd.f32 %v1284_v16, %v3273_v1  ;;  %v2012_v19 = vpop.f32.mrb[9].mxu1  ;;  %v2219_v1 = vld [vmem:[%s3260_s17 + $0x8] sm:$0xff]   ;;  %s3564_s17 = scalar_lea.vmem [#allocation14], %s3205_s19 }
 0x84a   : > { %v1287_v20 = vpop.f32.mrb[10].mxu1  ;;  %2017 = vmatpush3.bf16.msra.mxu0 %v2219_v1  ;;  %v1926_v44 = vld [vmem:[%s3564_s17] ss:$0 sm:$0xff]  ;;  %v1939_v19 = vld [vmem:[#allocation20] ss:$0 sm:$0xff] (!%p1936_p5) }
 0x84b   : > { %v1298_v21 = vadd.f32 %v1923_v17, %v1290_v18  ;;  %v2013_v22 = vpop.f32.mrb[11].mxu1  ;;  %2034 = vmatprep.subr.bf16.mxu0 (!%p1936_p5), %v2700_v6 }
 0x84d   : > { %v1301_v23 = vsel %vm915_vm0, %v1298_v21, 0.0 }
 0x84e   : > { %1302 = vadd.xlane.f32.xlu1 %v1301_v23 }
 0x8db   : > { %v1303_v24 = vpop.xlane.xlu1 %1302 }
 0x8dc   : > { %v1304_v25 = vmul.f32 0.03125, %v1303_v24 }
 0x8de   : > { %v1305_v26 = vsub.f32 %v1298_v21, %v1304_v25 }
 0x8e0   : > { %v1306_v27 = vmul.f32 %v1305_v26, %v1305_v26 }
 0x8e2   : > { %v1307_v28 = vsel %vm915_vm0, %v1306_v27, 0.0 }
 0x8e3   : > { %1308 = vadd.xlane.f32.xlu0 %v1307_v28 }
 0x970   : > { %v1309_v30 = vpop.xlane.xlu0 %1308 }
 0x971   : > { %v1310_v31 = vmul.f32 0.03125, %v1309_v30 }
 0x973   : > { %v1311_v32 = vadd.f32 1e-05, %v1310_v31 }
 0x975   : > { %2234 = vrsqrt.f32 %v1311_v32 }
 0x97f   : > { %v2235_v33 = vpop.eup %2234 }
 0x980   : > { %v1313_v35 = vmul.f32 %v2235_v33, %v1305_v26 }
 0x982   : > { %v1320_v37 = vmul.f32 %v1924_v34, %v1313_v35 }
 0x984   : > { %v1327_v38 = vadd.f32 %v1925_v36, %v1320_v37 }
 0x986   : > { %v1328_v39 = vpack.c.bf16 %v1327_v38, %v1327_v38 }
 0x988   : > { %2019 = vmatmul.mubr.msk.bf16.vlgmr.msra.gmra.mrb[12].mxu0 %vm915_vm0, %v1328_v39 }
 0x989   : > { %2038 = vmatprep.mubr.msk.bf16.mxu0 (!%p1936_p5), %vm2701_vm7, %v2700_v6  ;;  %2035 = vmatpush3.bf16.msra.mxu0 (!%p1936_p5), %v2238_v5 }
 0x98a   : > { %2036 = vmatprep.subr.bf16.mxu0 (!%p1936_p5), %v2700_v6 }
 0x98d   : > { %2037 = vmatpush3.bf16.msra.mxu0 (!%p1936_p5), %v2239_v7 }
 0xa5b   : > { %v1389_v45 = vpop.f32.mrb[12].mxu0 }
 0xa5c   : > { %v1390_v46 = vadd.f32 %v1926_v44, %v1389_v45  ;;  %v2020_v47 = vpop.f32.mrb[13].mxu0 }
 0xa5d   : > { %v1392_v48 = vpop.f32.mrb[14].mxu0 }
 0xa5e   : > { %v1396_v49 = vmul.f32 0.70710677, %v1390_v46  ;;  %v2021_v50 = vpop.f32.mrb[15].mxu0  ;;  %v1395_v52 = vmul.f32 0.5, %v1390_v46 }
 0xa60   : > { %2236 = verf.f32 %v1396_v49 }
 0xa6a   : > { %v2237_v51 = vpop.eup %2236 }
 0xa6b   : > { %v1398_v53 = vadd.f32 1.0, %v2237_v51 }
 0xa6d   : > { %v1399_v54 = vmul.f32 %v1398_v53, %v1395_v52 }
 0xa6f   : > { %v1400_v55 = vpack.c.bf16 %v1399_v54, %v1399_v54 }
 0xa71   : > { %2031 = vmatmul.mubr.msk.bf16.vlgmr.msra.gmra.mrb[12].mxu1 %vm1440_vm6, %v1400_v55 }
 0xb43   : > { %1489 = sbr.rel (%p1936_p5) target bundleno = 3419 (0xd5b), region = 166 }
 0xb44   : > { %v1478_v56 = vpop.f32.mrb[12].mxu1 }
 0xb45   : > { %v1479_v57 = vadd.f32 %v1930_v9, %v1478_v56  ;;  %v2032_v58 = vpop.f32.mrb[13].mxu1 }
 0xb46   : > { %v1481_v59 = vpop.f32.mrb[14].mxu1 }
 0xb47   : > { %v1484_v60 = vadd.f32 %v1479_v57, %v1298_v21  ;;  %v2033_v61 = vpop.f32.mrb[15].mxu1 }
 0xb49   : > { %1485 = vst.msk [vmem:[#allocation2] sm:$0xff] %vm915_vm0, %v1484_v60  ;;  %v1492_v62 = vsel (!%p1936_p5), %vm915_vm0, %v1484_v60, 0.0 }
 0xb4a   : > { %1493 = vadd.xlane.f32.xlu0 %v1492_v62 }
 0xbd7   : > { %v1494_v63 = vpop.xlane.xlu0 %1493 }
 0xbd8   : > { %v1495_v0 = vmul.f32 0.03125, %v1494_v63 }
 0xbda   : > { %v1496_v2 = vsub.f32 %v1484_v60, %v1495_v0 }
 0xbdc   : > { %v1497_v3 = vmul.f32 %v1496_v2, %v1496_v2 }
 0xbde   : > { %v1498_v4 = vsel %vm915_vm0, %v1497_v3, 0.0 }
 0xbdf   : > { %1499 = vadd.xlane.f32.xlu0 %v1498_v4 }
 0xc6c   : > { %v1500_v8 = vpop.xlane.xlu0 %1499 }
 0xc6d   : > { %v1501_v10 = vmul.f32 0.03125, %v1500_v8 }
 0xc6f   : > { %v1502_v11 = vadd.f32 1e-05, %v1501_v10 }
 0xc71   : > { %2240 = vrsqrt.f32 %v1502_v11 }
 0xc7b   : > { %v2241_v12 = vpop.eup %2240 }
 0xc7c   : > { %v1504_v14 = vmul.f32 %v2241_v12, %v1496_v2 }
 0xc7e   : > { %v1511_v16 = vmul.f32 %v1937_v13, %v1504_v14 }
 0xc80   : > { %v1518_v17 = vadd.f32 %v1938_v15, %v1511_v16 }
 0xc82   : > { %v1519_v18 = vpack.c.bf16 %v1518_v17, %v1518_v17 }
 0xc84   : > { %2039 = vmatmul.mubr.msk.bf16.vlgmr.msra.gmra.mrb[0].mxu0 %vm915_vm0, %v1519_v18 }
 0xd57   : > { %v1580_v20 = vpop.f32.mrb[0].mxu0 }
 0xd58   : > { %v1581_v21 = vadd.f32 %v1939_v19, %v1580_v20  ;;  %v2040_v22 = vpop.f32.mrb[1].mxu0 }
 0xd59   : > { %v1583_v23 = vpop.f32.mrb[2].mxu0 }
 0xd5a   : > { %1586 = vst [vmem:[%s839_s8] sm:$0xff] %v1581_v21  ;;  %v2041_v24 = vpop.f32.mrb[3].mxu0 }
 0xd5b PF: > { %s3568_s2 = sld [smem:[#allocation36_spill]]  ;;  %s3569_s6 = sld [smem:[#allocation33_spill]] }
 0xd5c   : > { %s3570_s13 = sld [smem:[#allocation42_spill]]  ;;  %s3571_s24 = sld [smem:[#allocation60_spill]] }
 0xd5d   : > { %s1601_s18 = sshll.u32 %s839_s8, 4  ;;  %s2702_s5 = smov [#allocation22]   ;;  %s1602_s18 = int_to_ptr.vmem [resolvable:$true] %s1601_s18 }
 0xd5e   : > { %s2536_s23 = scalar_lea.vmem %s1602_s18, 128  ;;  %s2540_s17 = sshll.u32 %s2702_s5, 4  ;;  %s2541_s17 = int_to_ptr.vmem [resolvable:$false] %s2540_s17 }
 0xd5f   : > { %p2537_p10 = scmp.ne.s32.totalorder %s1602_s18, %s2536_s23  ;;  %s2542_s21 = scalar_lea.vmem %s2541_s17, 256 }
 0xd60   : > { %p2543_p13 = scmp.lt.s32.totalorder %s1602_s18, %s2541_s17  ;;  %p2544_p0 = scmp.lt.s32.totalorder %s2542_s21, %s2536_s23 }
 0xd61   : > { %s1944_s22 = sshll.u32 %s3568_s2, 7  ;;  %s3573_s30 = sand.u32 1, %s3569_s6  }
 0xd62   : > { %s3572_s3 = smov %s3571_s24  ;;  %s3367_s1 = scalar_lea.hbm %s3571_s24, %s1944_s22 }
 0xd63   : > { %s1588_s4 = scalar_lea.sflag [#allocation7], %s3573_s30  ;;  %p3574_p9 = scmp.ne.s32.totalorder %s3570_s13, 0 }
 0xd64   : > { %p2545_p11 = por %p2544_p0, %p2543_p13 }
 0xd65   : > { %p2538_p7 = pnand %p2537_p10, %p3574_p9 }
 0xd67   : > { %p2539_p8 = pneg %p2538_p7 }
 0xd69   : > { %p2546_p12 = pnand %p2545_p11, %p2539_p8 }
 0xd6b   : > { %2549 = shalt.err (!%p2546_p12)
}
 0xd6c   : > { %s2550_s8 = scalar_lea.hbm %s3367_s1, 128  ;;  %s2554_s19 = scalar_lea.hbm %s3572_s3, 256 }
 0xd6d   : > { %p2551_p1 = scmp.ne.s32.totalorder %s3367_s1, %s2550_s8  ;;  %p2555_p2 = scmp.lt.u32.totalorder %s3367_s1, %s3572_s3 }
 0xd6e   : > { %p2556_p6 = scmp.lt.u32.totalorder %s2554_s19, %s2550_s8  ;;  %p2558_p10 = scmp.lt.u32.totalorder %s2550_s8, %s3367_s1 }
 0xd6f   : > { %p2552_p3 = pnand %p2551_p1, %p3574_p9 }
 0xd70   : > { %p2557_p5 = por %p2556_p6, %p2555_p2 }
 0xd71   : > { %p2553_p4 = pneg %p2552_p3 }
 0xd72   : > { %p2559_p7 = por %p2558_p10, %p2557_p5 }
 0xd74   : > { %p2560_p8 = pnand %p2559_p7, %p2553_p4 }
 0xd76   : > { %2563 = shalt.err (!%p2560_p8)
}
 0xd77   : > { %2068 = dma.vmem_to_hbm [thread:$0]  (%p3574_p9), %s1602_s18, 128, %s3367_s1, %s1588_s4  }
 0xd78 PF: > { %s3575_s27 = sld [smem:[#allocation39_spill]]  ;;  %s3576_s2 = sld [smem:[#allocation32_spill]] }
 0xd79   : > { %s3577_s6 = sld [smem:[#allocation43_spill]] }
 0xd7e   : > { %p2113_p13 = scmp.ge.s32.totalorder %s3575_s27, 2  ;;  %s1613_s22 = sand.u32 1, %s3576_s2  }
 0xd7f   : > { %p3578_p0 = scmp.ne.s32.totalorder %s3577_s6, 0  ;;  %s1614_s25 = scalar_lea.sflag [#allocation7], %s1613_s22 }
 0xd81   : > { %p2103_p11 = pnand %p2113_p13, %p3578_p0 }
 0xd83   : > { %2635 = dma.done.wait (!%p2103_p11), %s1614_s25, 128  }
 0xd84   : > { %2637 = vsyncadd (!%p2103_p11), %s1614_s25, 4294967168  ;;  %s44_s1 = sadd.s32 1, %s3575_s27   ;;  %s3579_s24 = sld [smem:[#allocation33_spill]] }
 0xd85   : > { %p41_p12 = scmp.ge.s32.totalorder %s44_s1, 6   ;;  %s3580_s13 = sld [smem:[#allocation34_spill]] }
 0xd86   : > { %s3581_s29 = sld [smem:[#allocation46_spill]]  ;;  %s3582_s0 = sld [smem:[#allocation37_spill]] }
 0xd87   : > { %s3583_s30 = sld [smem:[#allocation38_spill]]  ;;  %s3584_s18 = sld [smem:[#allocation44_spill]] }
 0xd88   : > { %s3585_s19 = sld [smem:[#allocation45_spill]]  ;;  %s3586_s25 = smov %s2648_s26 }
 0xd89   : > { %s3587_s26 = smov %s2998_s11  ;;  %s3588_s27 = smov %s2656_s28 }
 0xd8a   :  { %43 = sbr.rel (!%p41_p12) target bundleno = 32 (0x20), region = 276 }
 0xd8b   : > { %s3589_s28 = smov %s3580_s13 }
 0xd91   :  { %1619 = vsyncpa [#allocation6], 1 }
 0xd92   :  { %1621 = vsyncpa [#allocation6 + $0x1], 1 }
 0xd93   :  { %1622 = vsyncpa [#allocation9], 1 }
 0xd94   :  { %1624 = vsyncpa [#allocation9 + $0x1], 1 }
 0xd95   :  { %1625 = vsyncpa [#allocation12], 1 }
 0xd96   :  { %1627 = vsyncpa [#allocation12 + $0x1], 1 }
 0xd97   :  { %1628 = vsyncpa [#allocation15], 1 }
 0xd98   :  { %1630 = vsyncpa [#allocation15 + $0x1], 1 }
 0xd99   :  { %1631 = vsyncpa [#allocation18], 1 }
 0xd9a   :  { %1632 = vsyncpa [#allocation21], 1 }
 0xd9b   :  { %1633 = vsyncpa [#allocation7], 1 }
 0xd9c   :  { %1635 = vsyncpa [#allocation7 + $0x1], 1 }
 0xd9d   :  { %1636 = vsyncmov [#allocation4] }
 0xda0   :  { %s1637_s11 = vpop.sfrf %1636 }
 0xda1   :  { %p1947_p9 = scmp.ne.s32.totalorder %s1637_s11, 0 }
 0xda3   :  { %1641 = shalt.err (%p1947_p9)  }

</bundles_post_ra>
